<compile_context>
chip_gen: v7x
topology: tpu7x:2x2x1
jax: 0.10.0
libtpu: 0.0.40
codegen_flags: <defaults>
</compile_context>

<pallas_src>
import math

import jax
import jax.numpy as jnp
import numpy as np
from jax.experimental import pallas as pl
from jax.experimental.pallas import tpu as pltpu

STATE_DIM = 2          # Neural_Heat_PDE(state_dim=2)
HIDDEN = 64            # Neural_Density(hidden_dim=64)
BATCH = 64             # Neural_Heat_PDE(batch_size=64)
MAX_TIME = 10.0
IN_DIM = STATE_DIM + 1
LANES = 2 * HIDDEN     # packed a0|a lane width
assert LANES == 128, "lane-packing below assumes hidden_dim == 64"

# Column layout of the packed layer-1 LHS (built in the wrapper).
_C_BIAS0, _C_T0, _C_X00, _C_X01 = 0, 1, 2, 3   # initial-loss path (t = 0)
_C_BIAS1, _C_T1, _C_X10, _C_X11 = 4, 5, 6, 7   # kernel-loss path
_LHS_K = 128                                    # contraction width (zero padded)


def heat_pde_kernel(lhs_ref, r1_ref, rz_ref, rd_ref, rl_ref, b2_ref, out_ref):
    lhs = lhs_ref[0]                 # [B, 128] packed inputs for this draw
    b2 = b2_ref[...]                 # [1, 1]

    # ---- layer 1 (+bias) for BOTH paths in one MXU pass -------------------------
    # lanes 0..63  = a0 = W1 [0, x_init] + b1
    # lanes 64..127= a  = W1 [t, x_ker ] + b1
    a = jnp.dot(lhs, r1_ref[...], preferred_element_type=jnp.float32)   # [B,128]

    # ---- shared-exp softplus / sigmoid on the lane-packed block -----------------
    e = jnp.exp(jnp.minimum(a, 20.0))
    h = jnp.where(a > 20.0, a, jnp.log1p(e))      # softplus(a0|a)         [B,128]
    s = e / (1.0 + e)                             # softplus'(a0|a)        [B,128]
    spp = s * (1.0 - s)                           # softplus''(a0|a)       [B,128]

    # ---- layer-2 contractions on the MXU, w2 folded into precomputed RHS --------
    zz = jnp.dot(h, rz_ref[...], preferred_element_type=jnp.float32)    # col0=z0-b2, col1=z-b2
    dd = jnp.dot(s, rd_ref[...], preferred_element_type=jnp.float32)    # col0=dz/dt, col1=dz/dx0, col2=dz/dx1
    ll = jnp.dot(spp, rl_ref[...], preferred_element_type=jnp.float32)  # col0=d2z/dx0^2 + d2z/dx1^2

    # ---- outer softplus / sigmoid on (z0, z) together ----------------------------
    zb = zz[:, 0:2] + b2                                                # [B,2]
    ez = jnp.exp(jnp.minimum(zb, 20.0))
    sp_z = jnp.where(zb > 20.0, zb, jnp.log1p(ez))                      # softplus
    sg_z = ez / (1.0 + ez)                                              # sigmoid

    f0 = sp_z[:, 0:1]                 # rho(0, x_init)                   [B,1]
    s_z = sg_z[:, 1:2]                # softplus'(z)                     [B,1]
    spp_z = s_z * (1.0 - s_z)         # softplus''(z)                    [B,1]

    # ---- initial_loss (target Gaussian read back from the packed LHS columns) ----
    x0sq = lhs[:, _C_X00:_C_X00 + 1] ** 2 + lhs[:, _C_X01:_C_X01 + 1] ** 2
    var = 0.02
    log_norm = -0.5 * STATE_DIM * math.log(2.0 * math.pi * var)
    y0 = jnp.exp(log_norm - x0sq / (2.0 * var))
    loss_init = jnp.sum((f0 - y0) ** 2)

    # ---- kernel_loss (heat-equation residual), single fused reduction ------------
    dz_dt = dd[:, 0:1]
    dz_dx0 = dd[:, 1:2]
    dz_dx1 = dd[:, 2:3]
    lap_lin = ll[:, 0:1]
    resid = jnp.sum(-s_z * dz_dt
                    + 0.5 * (spp_z * (dz_dx0 * dz_dx0 + dz_dx1 * dz_dx1)
                             + s_z * lap_lin))
    kernel_loss = resid * resid

    out_ref[...] = jnp.reshape(loss_init + kernel_loss, (1, 1, 1))


def _build_constants(params):
    """Hoist every parameter-only product/layout into small MXU RHS matrices."""
    w1, b1, w2, b2 = params                  # [3,H], [1,H], [H,1], [1,1]
    H = HIDDEN
    w1_t, w1_x0, w1_x1 = w1[0], w1[1], w1[2]
    w2v = w2[:, 0]

    # layer-1 RHS: rows = LHS columns, cols = packed hidden lanes (a0 | a)
    r1 = jnp.zeros((_LHS_K, LANES), jnp.float32)
    r1 = r1.at[_C_BIAS0, 0:H].set(b1[0])
    r1 = r1.at[_C_X00, 0:H].set(w1_x0)
    r1 = r1.at[_C_X01, 0:H].set(w1_x1)
    r1 = r1.at[_C_BIAS1, H:2 * H].set(b1[0])
    r1 = r1.at[_C_T1, H:2 * H].set(w1_t)
    r1 = r1.at[_C_X10, H:2 * H].set(w1_x0)
    r1 = r1.at[_C_X11, H:2 * H].set(w1_x1)

    # z0 / z contraction against softplus(a0|a)
    rz = jnp.zeros((LANES, 128), jnp.float32)
    rz = rz.at[0:H, 0].set(w2v)              # z0 uses the a0 half (lanes 0..63)
    rz = rz.at[H:2 * H, 1].set(w2v)          # z  uses the a  half (lanes 64..127)

    # first derivatives against softplus'(a0|a): only the a half contributes
    rd = jnp.zeros((LANES, 128), jnp.float32)
    rd = rd.at[H:2 * H, 0].set(w2v * w1_t)
    rd = rd.at[H:2 * H, 1].set(w2v * w1_x0)
    rd = rd.at[H:2 * H, 2].set(w2v * w1_x1)

    # fused Laplacian linear term against softplus''(a0|a)
    rl = jnp.zeros((LANES, 128), jnp.float32)
    rl = rl.at[H:2 * H, 0].set(w2v * (w1_x0 * w1_x0 + w1_x1 * w1_x1))

    return r1, rz, rd, rl, b2


def _build_lhs(x_init, x_ker, t_ker):
    """Pack [1, 0, x_init | 1, t, x_ker | 0-pad] into a [D, B, 128] LHS."""
    D, B = x_init.shape[0], x_init.shape[1]
    lhs = jnp.zeros((D, B, _LHS_K), jnp.float32)
    lhs = lhs.at[:, :, _C_BIAS0].set(1.0)
    lhs = lhs.at[:, :, _C_X00:_C_X01 + 1].set(x_init)
    lhs = lhs.at[:, :, _C_BIAS1].set(1.0)
    lhs = lhs.at[:, :, _C_T1].set(t_ker[..., 0])
    lhs = lhs.at[:, :, _C_X10:_C_X11 + 1].set(x_ker)
    return lhs


@jax.jit
def neural_heat_pde_forward_batched(params, x_init, x_ker, t_ker):
    """x_init/x_ker: [n_draws, B, 2]; t_ker: [n_draws, B, 1]  ->  [n_draws] losses."""
    n_draws, B = x_init.shape[0], x_init.shape[1]
    r1, rz, rd, rl, b2 = _build_constants(params)
    lhs = _build_lhs(x_init, x_ker, t_ker)

    def _const_spec(shape):
        n = len(shape)
        return pl.BlockSpec(shape, lambda d: (0,) * n)

    out = pl.pallas_call(
        heat_pde_kernel,
        out_shape=jax.ShapeDtypeStruct((n_draws, 1, 1), jnp.float32),
        grid=(n_draws,),
        in_specs=[
            pl.BlockSpec((1, B, _LHS_K), lambda d: (d, 0, 0)),
            _const_spec((_LHS_K, LANES)),
            _const_spec((LANES, 128)),
            _const_spec((LANES, 128)),
            _const_spec((LANES, 128)),
            _const_spec((1, 1)),
        ],
        out_specs=pl.BlockSpec((1, 1, 1), lambda d: (d, 0, 0)),
        compiler_params=pltpu.CompilerParams(
            dimension_semantics=("parallel",)),   # draws shard across TCs on v7x
    )(lhs, r1, rz, rd, rl, b2)
    return out[:, 0, 0]


def neural_heat_pde_forward(params, x_init, x_ker, t_ker):
    """Single Monte-Carlo draw == one Neural_Heat_PDE.forward() call. Returns scalar."""
    losses = neural_heat_pde_forward_batched(
        params, x_init[None], x_ker[None], t_ker[None])
    return losses[0]


# ---------------- pure-JAX reference (autodiff, mirrors torch.autograd) ----------------
def _reference_loss(params, x_init, x_ker, t_ker):
    w1, b1, w2, b2 = params
    hi = jax.lax.Precision.HIGHEST

    def rho_single(t, x):                  # t: scalar, x: [STATE_DIM]
        u = jnp.concatenate([t[None], x])
        h = jax.nn.softplus(jnp.dot(u, w1, precision=hi) + b1[0])
        return jax.nn.softplus(jnp.dot(h, w2[:, 0], precision=hi) + b2[0, 0])

    f0 = jax.vmap(lambda x: rho_single(jnp.float32(0.0), x))(x_init)
    var = 0.02
    y0 = jnp.exp(-0.5 * STATE_DIM * jnp.log(2.0 * jnp.pi * var)
                 - jnp.sum(x_init * x_init, axis=-1) / (2.0 * var))
    loss_init = jnp.sum((f0 - y0) ** 2)

    dfdt = jnp.sum(jax.vmap(jax.grad(rho_single, argnums=0))(t_ker[:, 0], x_ker))
    hess = jax.vmap(jax.hessian(rho_single, argnums=1))(t_ker[:, 0], x_ker)
    lap = jnp.sum(jnp.trace(hess, axis1=-2, axis2=-1))
    return loss_init + (-dfdt + 0.5 * lap) ** 2


if __name__ == "__main__":
    key = jax.random.PRNGKey(0)
    ks = jax.random.split(key, 10)

    # deterministic parameter init (torch.nn.Linear-style uniform bounds)
    bnd1 = 1.0 / math.sqrt(IN_DIM)
    bnd2 = 1.0 / math.sqrt(HIDDEN)
    w1 = jax.random.uniform(ks[0], (IN_DIM, HIDDEN), jnp.float32, -bnd1, bnd1)
    b1 = jax.random.uniform(ks[1], (1, HIDDEN), jnp.float32, -bnd1, bnd1)
    w2 = jax.random.uniform(ks[2], (HIDDEN, 1), jnp.float32, -bnd2, bnd2)
    b2 = jax.random.uniform(ks[3], (1, 1), jnp.float32, -bnd2, bnd2)
    params = (w1, b1, w2, b2)

    # the module's x_t_sample_batch(): x ~ N(0, 5 I), t ~ U(0, max_time)
    x_init = math.sqrt(5.0) * jax.random.normal(ks[4], (BATCH, STATE_DIM), jnp.float32)
    x_ker = math.sqrt(5.0) * jax.random.normal(ks[5], (BATCH, STATE_DIM), jnp.float32)
    t_ker = jax.random.uniform(ks[6], (BATCH, 1), jnp.float32, 0.0, MAX_TIME)

    # single draw (== one forward())
    loss = neural_heat_pde_forward(params, x_init, x_ker, t_ker)
    jax.block_until_ready(loss)
    ref = _reference_loss(params, x_init, x_ker, t_ker)
    # small margin over 1e-4 to absorb f32 MXU reduction-order differences
    np.testing.assert_allclose(np.asarray(loss), np.asarray(ref), rtol=2e-4, atol=1e-6)

    # multiple Monte-Carlo draws on the "parallel" grid axis (2 TCs on v7x)
    n_draws = 4
    xb0 = math.sqrt(5.0) * jax.random.normal(ks[7], (n_draws, BATCH, STATE_DIM), jnp.float32)
    xbk = math.sqrt(5.0) * jax.random.normal(ks[8], (n_draws, BATCH, STATE_DIM), jnp.float32)
    tbk = jax.random.uniform(ks[9], (n_draws, BATCH, 1), jnp.float32, 0.0, MAX_TIME)

    losses = neural_heat_pde_forward_batched(params, xb0, xbk, tbk)
    jax.block_until_ready(losses)
    refs = jax.jit(jax.vmap(lambda a, c, t: _reference_loss(params, a, c, t)))(xb0, xbk, tbk)
    np.testing.assert_allclose(np.asarray(losses), np.asarray(refs), rtol=2e-4, atol=1e-6)

    print("KERNEL_OK")
</pallas_src>

<mosaic_0001>
module attributes {stable_mosaic.version = 11 : i64} {
  func.func @heat_pde_kernel(%arg0: i32, %arg1: memref<1x64x128xf32, #tpu.memory_space<vmem>>, %arg2: memref<128x128xf32, #tpu.memory_space<vmem>>, %arg3: memref<128x128xf32, #tpu.memory_space<vmem>>, %arg4: memref<128x128xf32, #tpu.memory_space<vmem>>, %arg5: memref<128x128xf32, #tpu.memory_space<vmem>>, %arg6: memref<1x1xf32, #tpu.memory_space<vmem>>, %arg7: memref<1x1x1xf32, #tpu.memory_space<vmem>>) attributes {dimension_semantics = [#tpu.dimension_semantics<parallel>], iteration_bounds = array<i64: 1>, scalar_prefetch = 0 : i64, scratch_operands = 0 : i64, tpu.core_type = #tpu.core_type<tc>, window_params = [{transform_indices = @transform_0, window_bounds = array<i64: 1, 64, 128>}, {pipeline_mode = #tpu.pipeline_mode<synchronous>, transform_indices = @transform_1, window_bounds = array<i64: 128, 128>}, {pipeline_mode = #tpu.pipeline_mode<synchronous>, transform_indices = @transform_2, window_bounds = array<i64: 128, 128>}, {pipeline_mode = #tpu.pipeline_mode<synchronous>, transform_indices = @transform_3, window_bounds = array<i64: 128, 128>}, {pipeline_mode = #tpu.pipeline_mode<synchronous>, transform_indices = @transform_4, window_bounds = array<i64: 128, 128>}, {pipeline_mode = #tpu.pipeline_mode<synchronous>, transform_indices = @transform_5, window_bounds = array<i64: 1, 1>}, {transform_indices = @transform_6, window_bounds = array<i64: 1, 1, 1>}]} {
    %c0 = arith.constant 0 : index
    %c0_0 = arith.constant 0 : index
    %c0_1 = arith.constant 0 : index
    %0 = vector.load %arg1[%c0, %c0_0, %c0_1] : memref<1x64x128xf32, #tpu.memory_space<vmem>>, vector<1x64x128xf32>
    %1 = vector.shape_cast %0 : vector<1x64x128xf32> to vector<64x128xf32>
    %c0_2 = arith.constant 0 : index
    %c0_3 = arith.constant 0 : index
    %2 = vector.load %arg6[%c0_2, %c0_3] : memref<1x1xf32, #tpu.memory_space<vmem>>, vector<1x1xf32>
    %c0_4 = arith.constant 0 : index
    %c0_5 = arith.constant 0 : index
    %3 = vector.load %arg2[%c0_4, %c0_5] : memref<128x128xf32, #tpu.memory_space<vmem>>, vector<128x128xf32>
    %cst = arith.constant dense<0.000000e+00> : vector<64x128xf32>
    %4 = tpu.matmul %1, %3, %cst {dimension_numbers = #tpu.dot_dimension_numbers<[1], [0], [0], [1], [0, 0, 1, 1], [], []>} : vector<64x128xf32>, vector<128x128xf32>, vector<64x128xf32> -> vector<64x128xf32>
    %cst_6 = arith.constant 2.000000e+01 : f32
    %5 = vector.broadcast %cst_6 : f32 to vector<64x128xf32>
    %6 = arith.minimumf %4, %5 : vector<64x128xf32>
    %7 = math.exp %6 : vector<64x128xf32>
    %cst_7 = arith.constant 2.000000e+01 : f32
    %8 = vector.broadcast %cst_7 : f32 to vector<64x128xf32>
    %9 = arith.cmpf ogt, %4, %8 : vector<64x128xf32>
    %10 = math.log1p %7 : vector<64x128xf32>
    %11 = arith.select %9, %4, %10 : vector<64x128xi1>, vector<64x128xf32>
    %cst_8 = arith.constant 1.000000e+00 : f32
    %12 = vector.broadcast %cst_8 : f32 to vector<64x128xf32>
    %13 = arith.addf %12, %7 : vector<64x128xf32>
    %14 = arith.divf %7, %13 : vector<64x128xf32>
    %cst_9 = arith.constant 1.000000e+00 : f32
    %15 = vector.broadcast %cst_9 : f32 to vector<64x128xf32>
    %16 = arith.subf %15, %14 : vector<64x128xf32>
    %17 = arith.mulf %14, %16 : vector<64x128xf32>
    %c0_10 = arith.constant 0 : index
    %c0_11 = arith.constant 0 : index
    %18 = vector.load %arg3[%c0_10, %c0_11] : memref<128x128xf32, #tpu.memory_space<vmem>>, vector<128x128xf32>
    %cst_12 = arith.constant dense<0.000000e+00> : vector<64x128xf32>
    %19 = tpu.matmul %11, %18, %cst_12 {dimension_numbers = #tpu.dot_dimension_numbers<[1], [0], [0], [1], [0, 0, 1, 1], [], []>} : vector<64x128xf32>, vector<128x128xf32>, vector<64x128xf32> -> vector<64x128xf32>
    %c0_13 = arith.constant 0 : index
    %c0_14 = arith.constant 0 : index
    %20 = vector.load %arg4[%c0_13, %c0_14] : memref<128x128xf32, #tpu.memory_space<vmem>>, vector<128x128xf32>
    %cst_15 = arith.constant dense<0.000000e+00> : vector<64x128xf32>
    %21 = tpu.matmul %14, %20, %cst_15 {dimension_numbers = #tpu.dot_dimension_numbers<[1], [0], [0], [1], [0, 0, 1, 1], [], []>} : vector<64x128xf32>, vector<128x128xf32>, vector<64x128xf32> -> vector<64x128xf32>
    %c0_16 = arith.constant 0 : index
    %c0_17 = arith.constant 0 : index
    %22 = vector.load %arg5[%c0_16, %c0_17] : memref<128x128xf32, #tpu.memory_space<vmem>>, vector<128x128xf32>
    %cst_18 = arith.constant dense<0.000000e+00> : vector<64x128xf32>
    %23 = tpu.matmul %17, %22, %cst_18 {dimension_numbers = #tpu.dot_dimension_numbers<[1], [0], [0], [1], [0, 0, 1, 1], [], []>} : vector<64x128xf32>, vector<128x128xf32>, vector<64x128xf32> -> vector<64x128xf32>
    %24 = vector.extract_strided_slice %19 {offsets = [0, 0], sizes = [64, 2], strides = [1, 1]} : vector<64x128xf32> to vector<64x2xf32>
    %25 = vector.broadcast %2 : vector<1x1xf32> to vector<64x2xf32>
    %26 = arith.addf %24, %25 : vector<64x2xf32>
    %cst_19 = arith.constant 2.000000e+01 : f32
    %27 = vector.broadcast %cst_19 : f32 to vector<64x2xf32>
    %28 = arith.minimumf %26, %27 : vector<64x2xf32>
    %29 = math.exp %28 : vector<64x2xf32>
    %cst_20 = arith.constant 2.000000e+01 : f32
    %30 = vector.broadcast %cst_20 : f32 to vector<64x2xf32>
    %31 = arith.cmpf ogt, %26, %30 : vector<64x2xf32>
    %32 = math.log1p %29 : vector<64x2xf32>
    %33 = arith.select %31, %26, %32 : vector<64x2xi1>, vector<64x2xf32>
    %cst_21 = arith.constant 1.000000e+00 : f32
    %34 = vector.broadcast %cst_21 : f32 to vector<64x2xf32>
    %35 = arith.addf %34, %29 : vector<64x2xf32>
    %36 = arith.divf %29, %35 : vector<64x2xf32>
    %37 = vector.extract_strided_slice %33 {offsets = [0, 0], sizes = [64, 1], strides = [1, 1]} : vector<64x2xf32> to vector<64x1xf32>
    %38 = vector.extract_strided_slice %36 {offsets = [0, 1], sizes = [64, 1], strides = [1, 1]} : vector<64x2xf32> to vector<64x1xf32>
    %cst_22 = arith.constant 1.000000e+00 : f32
    %39 = vector.broadcast %cst_22 : f32 to vector<64x1xf32>
    %40 = arith.subf %39, %38 : vector<64x1xf32>
    %41 = arith.mulf %38, %40 : vector<64x1xf32>
    %42 = vector.extract_strided_slice %1 {offsets = [0, 2], sizes = [64, 1], strides = [1, 1]} : vector<64x128xf32> to vector<64x1xf32>
    %43 = arith.mulf %42, %42 : vector<64x1xf32>
    %44 = vector.extract_strided_slice %1 {offsets = [0, 3], sizes = [64, 1], strides = [1, 1]} : vector<64x128xf32> to vector<64x1xf32>
    %45 = arith.mulf %44, %44 : vector<64x1xf32>
    %46 = arith.addf %43, %45 : vector<64x1xf32>
    %cst_23 = arith.constant 4.000000e-02 : f32
    %47 = vector.broadcast %cst_23 : f32 to vector<64x1xf32>
    %48 = arith.divf %46, %47 : vector<64x1xf32>
    %cst_24 = arith.constant 2.07414603 : f32
    %49 = vector.broadcast %cst_24 : f32 to vector<64x1xf32>
    %50 = arith.subf %49, %48 : vector<64x1xf32>
    %51 = math.exp %50 : vector<64x1xf32>
    %52 = arith.subf %37, %51 : vector<64x1xf32>
    %53 = arith.mulf %52, %52 : vector<64x1xf32>
    %54 = vector.shape_cast %53 : vector<64x1xf32> to vector<1x64x1xf32>
    %cst_25 = arith.constant dense<0.000000e+00> : vector<1xf32>
    %55 = vector.multi_reduction <add>, %54, %cst_25 [1, 2] : vector<1x64x1xf32> to vector<1xf32>
    %56 = vector.shape_cast %55 : vector<1xf32> to vector<1x1x1xf32>
    %57 = vector.extract %56[0, 0, 0] : f32 from vector<1x1x1xf32>
    %58 = vector.extract_strided_slice %21 {offsets = [0, 0], sizes = [64, 1], strides = [1, 1]} : vector<64x128xf32> to vector<64x1xf32>
    %59 = vector.extract_strided_slice %21 {offsets = [0, 1], sizes = [64, 1], strides = [1, 1]} : vector<64x128xf32> to vector<64x1xf32>
    %60 = vector.extract_strided_slice %21 {offsets = [0, 2], sizes = [64, 1], strides = [1, 1]} : vector<64x128xf32> to vector<64x1xf32>
    %61 = vector.extract_strided_slice %23 {offsets = [0, 0], sizes = [64, 1], strides = [1, 1]} : vector<64x128xf32> to vector<64x1xf32>
    %cst_26 = arith.constant 0.000000e+00 : f32
    %62 = vector.broadcast %cst_26 : f32 to vector<64x1xf32>
    %63 = arith.subf %62, %38 : vector<64x1xf32>
    %64 = arith.mulf %63, %58 : vector<64x1xf32>
    %65 = arith.mulf %59, %59 : vector<64x1xf32>
    %66 = arith.mulf %60, %60 : vector<64x1xf32>
    %67 = arith.addf %65, %66 : vector<64x1xf32>
    %68 = arith.mulf %41, %67 : vector<64x1xf32>
    %69 = arith.mulf %38, %61 : vector<64x1xf32>
    %70 = arith.addf %68, %69 : vector<64x1xf32>
    %cst_27 = arith.constant 5.000000e-01 : f32
    %71 = vector.broadcast %cst_27 : f32 to vector<64x1xf32>
    %72 = arith.mulf %71, %70 : vector<64x1xf32>
    %73 = arith.addf %64, %72 : vector<64x1xf32>
    %74 = vector.shape_cast %73 : vector<64x1xf32> to vector<1x64x1xf32>
    %cst_28 = arith.constant dense<0.000000e+00> : vector<1xf32>
    %75 = vector.multi_reduction <add>, %74, %cst_28 [1, 2] : vector<1x64x1xf32> to vector<1xf32>
    %76 = vector.shape_cast %75 : vector<1xf32> to vector<1x1x1xf32>
    %77 = vector.extract %76[0, 0, 0] : f32 from vector<1x1x1xf32>
    %78 = arith.mulf %77, %77 : f32
    %79 = arith.addf %57, %78 : f32
    %80 = vector.broadcast %79 : f32 to vector<1x1x1xf32>
    %c0_29 = arith.constant 0 : index
    %c0_30 = arith.constant 0 : index
    %c0_31 = arith.constant 0 : index
    %81 = vector.load %arg7[%c0_29, %c0_30, %c0_31] : memref<1x1x1xf32, #tpu.memory_space<vmem>>, vector<1x1x1xf32>
    tpu.vector_store %arg7[%c0_29, %c0_30, %c0_31], %80 {strides = array<i32>} : memref<1x1x1xf32, #tpu.memory_space<vmem>>, vector<1x1x1xf32>,
    return
  }
  func.func @transform_0(%arg0: i32) -> (i32, i32, i32) {
    %c0_i32 = arith.constant 0 : i32
    %c0_i32_0 = arith.constant 0 : i32
    %c0_i32_1 = arith.constant 0 : i32
    return %arg0, %c0_i32, %c0_i32_0 : i32, i32, i32
  }
  func.func @transform_1(%arg0: i32) -> (i32, i32) {
    %c0_i32 = arith.constant 0 : i32
    %c0_i32_0 = arith.constant 0 : i32
    %c0_i32_1 = arith.constant 0 : i32
    return %c0_i32, %c0_i32_0 : i32, i32
  }
  func.func @transform_2(%arg0: i32) -> (i32, i32) {
    %c0_i32 = arith.constant 0 : i32
    %c0_i32_0 = arith.constant 0 : i32
    %c0_i32_1 = arith.constant 0 : i32
    return %c0_i32, %c0_i32_0 : i32, i32
  }
  func.func @transform_3(%arg0: i32) -> (i32, i32) {
    %c0_i32 = arith.constant 0 : i32
    %c0_i32_0 = arith.constant 0 : i32
    %c0_i32_1 = arith.constant 0 : i32
    return %c0_i32, %c0_i32_0 : i32, i32
  }
  func.func @transform_4(%arg0: i32) -> (i32, i32) {
    %c0_i32 = arith.constant 0 : i32
    %c0_i32_0 = arith.constant 0 : i32
    %c0_i32_1 = arith.constant 0 : i32
    return %c0_i32, %c0_i32_0 : i32, i32
  }
  func.func @transform_5(%arg0: i32) -> (i32, i32) {
    %c0_i32 = arith.constant 0 : i32
    %c0_i32_0 = arith.constant 0 : i32
    %c0_i32_1 = arith.constant 0 : i32
    return %c0_i32, %c0_i32_0 : i32, i32
  }
  func.func @transform_6(%arg0: i32) -> (i32, i32, i32) {
    %c0_i32 = arith.constant 0 : i32
    %c0_i32_0 = arith.constant 0 : i32
    %c0_i32_1 = arith.constant 0 : i32
    return %arg0, %c0_i32, %c0_i32_0 : i32, i32, i32
  }
}

</mosaic_0001>

<bundles_post_ra>
// kernel: neural_heat_pde_forward_batched.1
= control target key start
LH: loop header
LB: loop body
LE: loop exit
PB: predicated region body
PF: predicated region fallthrough
CT: control target
= control target key end

     0   :  { %s2672_s0 = inlined_call_operand.vmem [shape: f32[1,64,128], index: 0, kind: input, shape index: {}]   ;;  %s2673_s1 = inlined_call_operand.vmem [shape: f32[128,128], index: 1, kind: input, shape index: {}]   ;;  %s2674_s2 = inlined_call_operand.vmem [shape: f32[128,128], index: 2, kind: input, shape index: {}]   ;;  %s2675_s3 = inlined_call_operand.vmem [shape: f32[128,128], index: 3, kind: input, shape index: {}]   ;;  %s2676_s4 = inlined_call_operand.vmem [shape: f32[128,128], index: 4, kind: input, shape index: {}]   ;;  %s2677_s5 = inlined_call_operand.<no memory space> [shape: f32[1,1], index: 5, kind: input, shape index: {}]   ;;  %s2678_s6 = inlined_call_operand.hbm [shape: f32[1,1,1], index: 6, kind: output, shape index: {}]  }
   0x1   :  { %v11_v0 = vstv %s2677_s5 }
   0x2   :  { %12 = vst [vmem:[#allocation2] sm:$0x1] %v11_v0 }
   0x3   :  { %v35_v1 = vld [vmem:[%s2673_s1] sm:$0xff]  ;;  %v36_v2 = vld [vmem:[%s2673_s1 + $0x8] sm:$0xff]  ;;  %v37_v3 = vld [vmem:[%s2673_s1 + $0x10] sm:$0xff] }
   0x4   :  { %v1510_v4 = vpack.c.bf16 %v36_v2, %v35_v1  ;;  %v38_v5 = vld [vmem:[%s2673_s1 + $0x18] sm:$0xff]  ;;  %v39_v7 = vld [vmem:[%s2673_s1 + $0x20] sm:$0xff]  ;;  %v40_v8 = vld [vmem:[%s2673_s1 + $0x28] sm:$0xff] }
   0x5   :  { %v1514_v6 = vpack.c.bf16 %v38_v5, %v37_v3  ;;  %v1518_v9 = vpack.c.bf16 %v40_v8, %v39_v7  ;;  %v1848_v10 = vld [vmem:[%s2672_s0] sm:$0xff]  ;;  %v41_v11 = vld [vmem:[%s2673_s1 + $0x30] sm:$0xff]  ;;  %v42_v12 = vld [vmem:[%s2673_s1 + $0x38] sm:$0xff] }
   0x6   :  { %1511 = vmatprep.subr.bf16.mxu0 %v1510_v4  ;;  %1366 = vmatprep.mubr.f32.mxu0 %v1848_v10 }
   0x7   :  { %1513 = vmatpush3.bf16.msra.mxu0 %v1510_v4 }
   0x8   :  { %1515 = vmatprep.subr.bf16.mxu0 %v1514_v6 }
   0xb   :  { %1517 = vmatpush3.bf16.msra.mxu0 %v1514_v6 }
   0xc   :  { %13 = vsyncpa [#allocation4], 0  ;;  %1519 = vmatprep.subr.bf16.mxu0 %v1518_v9  ;;  %v1522_v13 = vpack.c.bf16 %v42_v12, %v41_v11  ;;  %v43_v14 = vld [vmem:[%s2673_s1 + $0x40] sm:$0xff]  ;;  %v44_v15 = vld [vmem:[%s2673_s1 + $0x48] sm:$0xff]  ;;  %s1787_s7 = smov 126   ;;  %s1788_s10 = smov [#allocation3]  }
   0xd   :  { %v1526_v16 = vpack.c.bf16 %v44_v15, %v43_v14  ;;  %v45_v17 = vld [vmem:[%s2673_s1 + $0x50] sm:$0xff]  ;;  %v46_v18 = vld [vmem:[%s2673_s1 + $0x58] sm:$0xff]  ;;  %v47_v20 = vld [vmem:[%s2673_s1 + $0x60] sm:$0xff] }
   0xe   :  { %v1530_v19 = vpack.c.bf16 %v46_v18, %v45_v17  ;;  %v48_v21 = vld [vmem:[%s2673_s1 + $0x68] sm:$0xff]  ;;  %v49_v23 = vld [vmem:[%s2673_s1 + $0x70] sm:$0xff]  ;;  %v50_v24 = vld [vmem:[%s2673_s1 + $0x78] sm:$0xff]  ;;  %s1229_s1 = sshll.u32 %s1788_s10, 4  ;;  %s1230_s1 = int_to_ptr.vmem [resolvable:$true] %s1229_s1 }
   0xf   :  { %1521 = vmatpush3.bf16.msra.mxu0 %v1518_v9  ;;  %v1534_v22 = vpack.c.bf16 %v48_v21, %v47_v20  ;;  %v1538_v25 = vpack.c.bf16 %v50_v24, %v49_v23  ;;  %v1884_v26 = vld [vmem:[%s2672_s0 + $0x8] sm:$0xff]  ;;  %v1889_v27 = vld [vmem:[%s2672_s0 + $0x10] sm:$0xff]  ;;  %v1896_v28 = vld [vmem:[%s2672_s0 + $0x18] sm:$0xff]  ;;  %v1784_v23 = vmov 0   ;;  %v2034_v24 = vmul.f32 %v1848_v10, %v1848_v10  ;;  %s1760_s12 = scalar_lea.vmem %s1230_s1, 16  ;;  %s1764_s13 = scalar_lea.vmem %s1230_s1, 32 }
  0x10   :  { %1523 = vmatprep.subr.bf16.mxu0 %v1522_v13  ;;  %v1901_v29 = vld [vmem:[%s2672_s0 + $0x20] sm:$0xff]  ;;  %v1908_v30 = vld [vmem:[%s2672_s0 + $0x28] sm:$0xff]  ;;  %v1913_v31 = vld [vmem:[%s2672_s0 + $0x30] sm:$0xff]  ;;  %1647 = vset.pattern.permute.xlu0 %v1784_v23  ;;  %p1761_p0 = scmp.ne.s32.totalorder %s1230_s1, %s1760_s12  ;;  %p1765_p1 = scmp.lt.s32.totalorder %s1230_s1, %s1230_s1 }
  0x11   :  { %v1920_v32 = vld [vmem:[%s2672_s0 + $0x38] sm:$0xff]  ;;  %v429_v33 = vld [vmem:[%s2675_s3] sm:$0xff]  ;;  %v430_v34 = vld [vmem:[%s2675_s3 + $0x8] sm:$0xff]  ;;  %v2056_v10 = vmul.f32 %v1908_v30, %v1908_v30  ;;  %p1766_p2 = scmp.lt.s32.totalorder %s1764_s13, %s1760_s12 }
  0x12   :  { %v1574_v35 = vpack.c.bf16 %v430_v34, %v429_v33  ;;  %v308_v36 = vld [vmem:[%s2674_s2] sm:$0xff]  ;;  %v309_v37 = vld [vmem:[%s2674_s2 + $0x8] sm:$0xff]  ;;  %v431_v39 = vld [vmem:[%s2675_s3 + $0x10] sm:$0xff]  ;;  %v2044_v33 = vmul.f32 %v1896_v28, %v1896_v28 }
  0x13   :  { %1525 = vmatpush3.bf16.msra.mxu0 %v1522_v13  ;;  %v1542_v38 = vpack.c.bf16 %v309_v37, %v308_v36  ;;  %v432_v40 = vld [vmem:[%s2675_s3 + $0x18] sm:$0xff]  ;;  %v310_v42 = vld [vmem:[%s2674_s2 + $0x10] sm:$0xff]  ;;  %v433_v45 = vld [vmem:[%s2675_s3 + $0x20] sm:$0xff]  ;;  %p1767_p3 = por %p1766_p2, %p1765_p1 }
  0x14   :  { %1527 = vmatprep.subr.bf16.mxu0 %v1526_v16  ;;  %v1578_v41 = vpack.c.bf16 %v432_v40, %v431_v39  ;;  %v311_v43 = vld [vmem:[%s2674_s2 + $0x18] sm:$0xff]  ;;  %v434_v46 = vld [vmem:[%s2675_s3 + $0x28] sm:$0xff]  ;;  %v312_v48 = vld [vmem:[%s2674_s2 + $0x20] sm:$0xff] }
  0x15   :  { %1543 = vmatprep.subr.bf16.mxu1 %v1542_v38  ;;  %v1546_v44 = vpack.c.bf16 %v311_v43, %v310_v42  ;;  %v1582_v47 = vpack.c.bf16 %v434_v46, %v433_v45  ;;  %v313_v49 = vld [vmem:[%s2674_s2 + $0x28] sm:$0xff]  ;;  %v435_v51 = vld [vmem:[%s2675_s3 + $0x30] sm:$0xff]  ;;  %v436_v52 = vld [vmem:[%s2675_s3 + $0x38] sm:$0xff]  ;;  %p1768_p4 = pnand %p1767_p3, %p1761_p0 }
  0x16   :  { %1545 = vmatpush3.bf16.msra.mxu1 %v1542_v38  ;;  %v1550_v50 = vpack.c.bf16 %v313_v49, %v312_v48  ;;  %v1586_v53 = vpack.c.bf16 %v436_v52, %v435_v51  ;;  %v314_v54 = vld [vmem:[%s2674_s2 + $0x30] sm:$0xff]  ;;  %v315_v55 = vld [vmem:[%s2674_s2 + $0x38] sm:$0xff]  ;;  %v437_v57 = vld [vmem:[%s2675_s3 + $0x40] sm:$0xff] }
  0x17   :  { %1529 = vmatpush3.bf16.msra.mxu0 %v1526_v16  ;;  %1547 = vmatprep.subr.bf16.mxu1 %v1546_v44  ;;  %v1554_v56 = vpack.c.bf16 %v315_v55, %v314_v54  ;;  %v438_v58 = vld [vmem:[%s2675_s3 + $0x48] sm:$0xff]  ;;  %v316_v60 = vld [vmem:[%s2674_s2 + $0x40] sm:$0xff]  ;;  %v439_v63 = vld [vmem:[%s2675_s3 + $0x50] sm:$0xff] }
  0x18   :  { %1531 = vmatprep.subr.bf16.mxu0 %v1530_v19  ;;  %v1590_v59 = vpack.c.bf16 %v438_v58, %v437_v57  ;;  %v317_v61 = vld [vmem:[%s2674_s2 + $0x48] sm:$0xff]  ;;  %v440_v0 = vld [vmem:[%s2675_s3 + $0x58] sm:$0xff]  ;;  %v318_v1 = vld [vmem:[%s2674_s2 + $0x50] sm:$0xff] }
  0x19   :  { %v1558_v62 = vpack.c.bf16 %v317_v61, %v316_v60  ;;  %v1594_v2 = vpack.c.bf16 %v440_v0, %v439_v63  ;;  %v319_v3 = vld [vmem:[%s2674_s2 + $0x58] sm:$0xff]  ;;  %v441_v4 = vld [vmem:[%s2675_s3 + $0x60] sm:$0xff]  ;;  %v442_v5 = vld [vmem:[%s2675_s3 + $0x68] sm:$0xff] }
  0x1a   :  { %1549 = vmatpush3.bf16.msra.mxu1 %v1546_v44  ;;  %v1562_v6 = vpack.c.bf16 %v319_v3, %v318_v1  ;;  %v1598_v7 = vpack.c.bf16 %v442_v5, %v441_v4  ;;  %v320_v8 = vld [vmem:[%s2674_s2 + $0x60] sm:$0xff]  ;;  %v321_v9 = vld [vmem:[%s2674_s2 + $0x68] sm:$0xff]  ;;  %v443_v11 = vld [vmem:[%s2675_s3 + $0x70] sm:$0xff] }
  0x1b   :  { %1533 = vmatpush3.bf16.msra.mxu0 %v1530_v19  ;;  %1551 = vmatprep.subr.bf16.mxu1 %v1550_v50  ;;  %v1566_v12 = vpack.c.bf16 %v321_v9, %v320_v8  ;;  %v444_v13 = vld [vmem:[%s2675_s3 + $0x78] sm:$0xff]  ;;  %v322_v14 = vld [vmem:[%s2674_s2 + $0x70] sm:$0xff]  ;;  %v550_v18 = vld [vmem:[%s2676_s4] sm:$0xff] }
  0x1c   :  { %1535 = vmatprep.subr.bf16.mxu0 %v1534_v22  ;;  %v323_v15 = vld [vmem:[%s2674_s2 + $0x78] sm:$0xff]  ;;  %v1602_v16 = vpack.c.bf16 %v444_v13, %v443_v11  ;;  %v551_v19 = vld [vmem:[%s2676_s4 + $0x8] sm:$0xff]  ;;  %v1237_v21 = vld [vmem:[#allocation2] ss:$0 sm:$0xff]  ;;  %s1785_s2 = smov 127  }
  0x1d   :  { %v1570_v17 = vpack.c.bf16 %v323_v15, %v322_v14  ;;  %v2025_v20 = vpack.c.bf16 %v551_v19, %v550_v18  ;;  %677 = vperm.xlu0 %1647, %v1237_v21   ;;  %v552_v63 = vld [vmem:[%s2676_s4 + $0x10] sm:$0xff]  ;;  %v553_v0 = vld [vmem:[%s2676_s4 + $0x18] sm:$0xff]  ;;  %v554_v3 = vld [vmem:[%s2676_s4 + $0x20] sm:$0xff] }
  0x1e   :  { %1553 = vmatpush3.bf16.msra.mxu1 %v1550_v50  ;;  %v555_v4 = vld [vmem:[%s2676_s4 + $0x28] sm:$0xff] }
  0x1f   :  { %1537 = vmatpush3.bf16.msra.mxu0 %v1534_v22  ;;  %1555 = vmatprep.subr.bf16.mxu1 %v1554_v56  ;;  %v2030_v22 = vmul.f32 %v1884_v26, %v1884_v26  ;;  %v2133_v15 = vpack.c.bf16 %v555_v4, %v554_v3 }
  0x20   :  { %1539 = vmatprep.subr.bf16.mxu0 %v1538_v25 }
  0x21   :  { %858 = vrot.lane.b32.xlu1 %v2030_v22, %s1785_s2  ;;  %856 = vrot.lane.b32.xlu0 %v2034_v24, %s1785_s2 }
  0x22   :  { %1557 = vmatpush3.bf16.msra.mxu1 %v1554_v56 }
  0x23   :  { %1541 = vmatpush3.bf16.msra.mxu0 %v1538_v25  ;;  %1559 = vmatprep.subr.bf16.mxu1 %v1558_v62  ;;  %v2038_v25 = vmul.f32 %v1889_v27, %v1889_v27 }
  0x24   :  { %1575 = vmatprep.subr.bf16.mxu0 %v1574_v35 }
  0x25   :  { %860 = vrot.lane.b32.xlu1 %v2038_v25, %s1785_s2  ;;  %862 = vrot.lane.b32.xlu0 %v2044_v33, %s1785_s2 }
  0x26   :  { %1367 = vmatmul.mubr.f32.vlgmr.msra.gmra.mrb[0].mxu0 %v1884_v26  ;;  %1561 = vmatpush3.bf16.msra.mxu1 %v1558_v62  ;;  %v2048_v26 = vmul.f32 %v1901_v29, %v1901_v29 }
  0x27   :  { %1369 = vmatprep.mubr.f32.mxu0 %v1889_v27  ;;  %1577 = vmatpush3.bf16.msra.mxu0 %v1574_v35  ;;  %v2060_v27 = vmul.f32 %v1913_v31, %v1913_v31 }
  0x28   :  { %1579 = vmatprep.subr.bf16.mxu0 %v1578_v41  ;;  %1563 = vmatprep.subr.bf16.mxu1 %v1562_v6 }
  0x29   :  { %864 = vrot.lane.b32.xlu1 %v2048_v26, %s1785_s2  ;;  %866 = vrot.lane.b32.xlu0 %v2056_v10, %s1785_s2 }
  0x2a   :  { %1370 = vmatmul.mubr.f32.gmra.mrb[2].mxu0 %v1896_v28  ;;  %1565 = vmatpush3.bf16.msra.mxu1 %v1562_v6  ;;  %v2068_v28 = vmul.f32 %v1920_v32, %v1920_v32 }
  0x2b   :  { %1372 = vmatprep.mubr.f32.mxu0 %v1901_v29  ;;  %1581 = vmatpush3.bf16.msra.mxu0 %v1578_v41 }
  0x2c   :  { %1583 = vmatprep.subr.bf16.mxu0 %v1582_v47  ;;  %1567 = vmatprep.subr.bf16.mxu1 %v1566_v12 }
  0x2d   :  { %868 = vrot.lane.b32.xlu1 %v2060_v27, %s1785_s2  ;;  %870 = vrot.lane.b32.xlu0 %v2068_v28, %s1785_s2 }
  0x2e   :  { %1373 = vmatmul.mubr.f32.gmra.mrb[4].mxu0 %v1908_v30  ;;  %1569 = vmatpush3.bf16.msra.mxu1 %v1566_v12  ;;  %v2129_v12 = vpack.c.bf16 %v553_v0, %v552_v63 }
  0x2f   :  { %1375 = vmatprep.mubr.f32.mxu0 %v1913_v31  ;;  %1585 = vmatpush3.bf16.msra.mxu0 %v1582_v47 }
  0x30   :  { %1587 = vmatprep.subr.bf16.mxu0 %v1586_v53  ;;  %1571 = vmatprep.subr.bf16.mxu1 %v1570_v17 }
  0x32   :  { %1376 = vmatmul.mubr.f32.gmra.mrb[6].mxu0 %v1920_v32  ;;  %1573 = vmatpush3.bf16.msra.mxu1 %v1570_v17 }
  0x33   :  { %1589 = vmatpush3.bf16.msra.mxu0 %v1586_v53  ;;  %1607 = vmatprep.subr.bf16.mxu1 %v2025_v20 }
  0x34   :  { %1591 = vmatprep.subr.bf16.mxu0 %v1590_v59 }
  0x37   :  { %1593 = vmatpush3.bf16.msra.mxu0 %v1590_v59 }
  0x38   :  { %1595 = vmatprep.subr.bf16.mxu0 %v1594_v2 }
  0x3b   :  { %1597 = vmatpush3.bf16.msra.mxu0 %v1594_v2 }
  0x3c   :  { %1599 = vmatprep.subr.bf16.mxu0 %v1598_v7 }
  0x3f   :  { %1601 = vmatpush3.bf16.msra.mxu0 %v1598_v7 }
  0x40   :  { %1603 = vmatprep.subr.bf16.mxu0 %v1602_v16 }
  0x43   :  { %1605 = vmatpush3.bf16.msra.mxu0 %v1602_v16 }
  0xf9   :  { %v2076_v29 = vpop.f32.mrb[0].mxu0 }
  0xfa   :  { %v157_v30 = vmin.f32 %v2076_v29, 20.0  ;;  %v2079_v31 = vpop.f32.mrb[1].mxu0  ;;  %vm181_vm2 = vcmp.gt.f32.partialorder %v2076_v29, 20.0 }
  0xfb   :  { %v156_v34 = vmin.f32 %v2079_v31, 20.0  ;;  %vm180_vm0 = vcmp.gt.f32.partialorder %v2079_v31, 20.0 }
  0xfc   :  { %v166_v35 = vmul.f32 1.442695, %v157_v30 }
  0xfd   :  { %v164_v32 = vmul.f32 1.442695, %v156_v34  ;;  %v2082_v36 = vpop.f32.mrb[2].mxu0 }
  0xfe   :  { %1648 = vpow2.f32 %v166_v35  ;;  %v159_v37 = vmin.f32 %v2082_v36, 20.0  ;;  %v2085_v38 = vpop.f32.mrb[3].mxu0  ;;  %vm183_vm5 = vcmp.gt.f32.partialorder %v2082_v36, 20.0 }
  0xff   :  { %1650 = vpow2.f32 %v164_v32  ;;  %v158_v39 = vmin.f32 %v2085_v38, 20.0  ;;  %vm182_vm4 = vcmp.gt.f32.partialorder %v2085_v38, 20.0 }
 0x100   :  { %v170_v40 = vmul.f32 1.442695, %v159_v37 }
 0x101   :  { %v168_v41 = vmul.f32 1.442695, %v158_v39  ;;  %v2088_v42 = vpop.f32.mrb[4].mxu0 }
 0x102   :  { %1652 = vpow2.f32 %v170_v40  ;;  %v161_v43 = vmin.f32 %v2088_v42, 20.0  ;;  %v2091_v44 = vpop.f32.mrb[5].mxu0  ;;  %vm185_vm10 = vcmp.gt.f32.partialorder %v2088_v42, 20.0 }
 0x103   :  { %1654 = vpow2.f32 %v168_v41  ;;  %v160_v45 = vmin.f32 %v2091_v44, 20.0  ;;  %vm184_vm11 = vcmp.gt.f32.partialorder %v2091_v44, 20.0 }
 0x104   :  { %v174_v46 = vmul.f32 1.442695, %v161_v43 }
 0x105   :  { %v172_v47 = vmul.f32 1.442695, %v160_v45  ;;  %v2094_v48 = vpop.f32.mrb[6].mxu0 }
 0x106   :  { %1656 = vpow2.f32 %v174_v46  ;;  %v163_v49 = vmin.f32 %v2094_v48, 20.0  ;;  %v2097_v50 = vpop.f32.mrb[7].mxu0  ;;  %vm187_vm15 = vcmp.gt.f32.partialorder %v2094_v48, 20.0 }
 0x107   :  { %1658 = vpow2.f32 %v172_v47  ;;  %v162_v51 = vmin.f32 %v2097_v50, 20.0  ;;  %vm186_vm14 = vcmp.gt.f32.partialorder %v2097_v50, 20.0 }
 0x108   :  { %v2100_v52 = vpop.eup %1648  ;;  %v178_v53 = vmul.f32 1.442695, %v163_v49 }
 0x109   :  { %v1651_v54 = vpop.eup %1650  ;;  %v176_v55 = vmul.f32 1.442695, %v162_v51  ;;  %v197_v56 = vadd.f32 1.0, %v2100_v52  ;;  %v200_v60 = vmul.f32 -0.5, %v2100_v52  ;;  %v203_v2 = vand.u32 2147483647, %v2100_v52 }
 0x10a   :  { %1660 = vpow2.f32 %v178_v53  ;;  %v188_v57 = vadd.f32 1.0, %v1651_v54  ;;  %v191_v1 = vmul.f32 -0.5, %v1651_v54  ;;  %v194_v6 = vand.u32 2147483647, %v1651_v54 }
 0x10b   :  { %1662 = vpow2.f32 %v176_v55  ;;  %v201_v9 = vadd.f32 1.0, %v200_v60  ;;  %vm2136_vm1 = vcmp.lt.f32.partialorder %v203_v2, 0.0004427343 }
 0x10c   :  { %v2103_v58 = vpop.eup %1652  ;;  %1664 = vrcp.f32 %v188_v57  ;;  %v192_v16 = vadd.f32 1.0, %v191_v1  ;;  %vm2143_vm3 = vcmp.lt.f32.partialorder %v194_v6, 0.0004427343 }
 0x10d   :  { %v2105_v59 = vpop.eup %1654  ;;  %1666 = vrcp.f32 %v197_v56  ;;  %v215_v61 = vadd.f32 1.0, %v2103_v58  ;;  %v218_v7 = vmul.f32 -0.5, %v2103_v58  ;;  %v202_v34 = vmul.f32 %v2100_v52, %v201_v9 }
 0x10e   :  { %1668 = vlog2.f32 %v188_v57  ;;  %v206_v62 = vadd.f32 1.0, %v2105_v59  ;;  %v209_v11 = vmul.f32 -0.5, %v2105_v59  ;;  %v212_v21 = vand.u32 2147483647, %v2105_v59 }
 0x10f   :  { %1670 = vlog2.f32 %v197_v56  ;;  %v219_v23 = vadd.f32 1.0, %v218_v7  ;;  %v193_v46 = vmul.f32 %v1651_v54, %v192_v16  ;;  %v221_v47 = vand.u32 2147483647, %v2103_v58 }
 0x110   :  { %v2123_v5 = vpop.eup %1656  ;;  %1672 = vrcp.f32 %v206_v62  ;;  %v210_v35 = vadd.f32 1.0, %v209_v11  ;;  %vm2163_vm6 = vcmp.lt.f32.partialorder %v212_v21, 0.0004427343  ;;  %v565_v21 = vld [vmem:[%s2676_s4 + $0x78] sm:$0xff] }
 0x111   :  { %v2126_v8 = vpop.eup %1658  ;;  %1674 = vrcp.f32 %v215_v61  ;;  %v233_v14 = vadd.f32 1.0, %v2123_v5  ;;  %v236_v39 = vmul.f32 -0.5, %v2123_v5  ;;  %v220_v55 = vmul.f32 %v2103_v58, %v219_v23 }
 0x112   :  { %1676 = vlog2.f32 %v206_v62  ;;  %v224_v13 = vadd.f32 1.0, %v2126_v8  ;;  %v227_v32 = vmul.f32 -0.5, %v2126_v8  ;;  %v211_v57 = vmul.f32 %v2105_v59, %v210_v35 }
 0x113   :  { %1678 = vlog2.f32 %v215_v61  ;;  %v230_v60 = vand.u32 2147483647, %v2126_v8  ;;  %v237_v63 = vadd.f32 1.0, %v236_v39  ;;  %vm2191_vm7 = vcmp.lt.f32.partialorder %v221_v47, 0.0004427343  ;;  %v556_v39 = vld [vmem:[%s2676_s4 + $0x30] sm:$0xff] }
 0x114   :  { %v2140_v18 = vpop.eup %1660  ;;  %1680 = vrcp.f32 %v224_v13  ;;  %v228_v62 = vadd.f32 1.0, %v227_v32 }
 0x115   :  { %v2148_v30 = vpop.eup %1662  ;;  %1682 = vrcp.f32 %v233_v14  ;;  %v251_v41 = vadd.f32 1.0, %v2140_v18  ;;  %v254_v11 = vmul.f32 -0.5, %v2140_v18  ;;  %vm2198_vm8 = vcmp.lt.f32.partialorder %v230_v60, 0.0004427343 }
 0x116   :  { %v1665_v37 = vpop.eup %1664  ;;  %1684 = vlog2.f32 %v224_v13  ;;  %v242_v40 = vadd.f32 1.0, %v2148_v30  ;;  %v245_v3 = vmul.f32 -0.5, %v2148_v30  ;;  %v229_v19 = vmul.f32 %v2126_v8, %v228_v62 }
 0x117   :  { %v1667_v43 = vpop.eup %1666  ;;  %v2156_v45 = vmul.f32 %v1665_v37, %v1651_v54  ;;  %1686 = vlog2.f32 %v233_v14  ;;  %v248_v37 = vand.u32 2147483647, %v2148_v30 }
 0x118   :  { %v1669_v49 = vpop.eup %1668  ;;  %v2161_v51 = vmul.f32 %v1667_v43, %v2100_v52  ;;  %1688 = vrcp.f32 %v242_v40  ;;  %v246_v32 = vadd.f32 1.0, %v245_v3 }
 0x119   :  { %v1671_v56 = vpop.eup %1670  ;;  %1454 = vmatprep.mubr.f32.mxu0 %v2156_v45  ;;  %v190_v54 = vmul.f32 0.6931472, %v1669_v49  ;;  %1690 = vrcp.f32 %v251_v41  ;;  %vm2244_vm12 = vcmp.lt.f32.partialorder %v248_v37, 0.0004427343 }
 0x11a   :  { %v1673_v61 = vpop.eup %1672  ;;  %1455 = vmatmul.mubr.f32.vlgmr.msra.gmra.mrb[8].mxu0 %v2161_v51  ;;  %v199_v52 = vmul.f32 0.6931472, %v1671_v56  ;;  %1692 = vlog2.f32 %v242_v40  ;;  %v557_v40 = vld [vmem:[%s2676_s4 + $0x38] sm:$0xff]  ;;  %v257_v56 = vand.u32 2147483647, %v2140_v18 }
 0x11b   :  { %v1675_v0 = vpop.eup %1674  ;;  %v196_v1 = vsel %vm2143_vm3, %v193_v46, %v190_v54  ;;  %v2175_v2 = vmul.f32 %v1673_v61, %v2105_v59  ;;  %1694 = vlog2.f32 %v251_v41  ;;  %v255_v46 = vadd.f32 1.0, %v254_v11 }
 0x11c   :  { %v1677_v4 = vpop.eup %1676  ;;  %v260_v6 = vsel %vm180_vm0, %v2079_v31, %v196_v1  ;;  %v205_v7 = vsel %vm2136_vm1, %v202_v34, %v199_v52  ;;  %v2184_v9 = vmul.f32 %v1675_v0, %v2103_v58  ;;  %v239_v31 = vand.u32 2147483647, %v2123_v5 }
 0x11d   :  { %v1679_v13 = vpop.eup %1678  ;;  %1410 = vmatprep.mubr.f32.mxu1 %v260_v6  ;;  %v261_v59 = vsel %vm181_vm2, %v2076_v29, %v205_v7  ;;  %1457 = vmatprep.mubr.f32.mxu0 %v2175_v2  ;;  %v208_v14 = vmul.f32 0.6931472, %v1677_v4  ;;  %v238_v29 = vmul.f32 %v2123_v5, %v237_v63  ;;  %v1618_v54 = vpack.c.bf16 %v557_v40, %v556_v39  ;;  %v859_v6 = vpop.permute.xlu1 %858 }
 0x11e   :  { %v1681_v17 = vpop.eup %1680  ;;  %1411 = vmatmul.mubr.f32.vlgmr.msra.gmra.mrb[0].mxu1 %v261_v59  ;;  %1458 = vmatmul.mubr.f32.gmra.mrb[10].mxu0 %v2184_v9  ;;  %v217_v58 = vmul.f32 0.6931472, %v1679_v13  ;;  %vm2229_vm9 = vcmp.lt.f32.partialorder %v239_v31, 0.0004427343  ;;  %v247_v61 = vmul.f32 %v2148_v30, %v246_v32  ;;  %v256_v1 = vmul.f32 %v2140_v18, %v255_v46 }
 0x11f   :  { %v1683_v23 = vpop.eup %1682  ;;  %1609 = vmatpush3.bf16.msra.mxu1 %v2025_v20  ;;  %v214_v34 = vsel %vm2163_vm6, %v211_v57, %v208_v14  ;;  %v2207_v35 = vmul.f32 %v1681_v17, %v2126_v8  ;;  %vm2263_vm13 = vcmp.lt.f32.partialorder %v257_v56, 0.0004427343  ;;  %v292_v7 = vsub.f32 1.0, %v2156_v45  ;;  %v561_v17 = vld [vmem:[%s2676_s4 + $0x58] sm:$0xff] }
 0x120   :  { %v1685_v41 = vpop.eup %1684  ;;  %v262_v20 = vsel %vm182_vm4, %v2085_v38, %v214_v34  ;;  %1611 = vmatprep.subr.bf16.mxu1 %v2129_v12  ;;  %v223_v8 = vsel %vm2191_vm7, %v220_v55, %v217_v58  ;;  %v2223_v43 = vmul.f32 %v1683_v23, %v2123_v5  ;;  %v562_v58 = vld [vmem:[%s2676_s4 + $0x60] sm:$0xff]  ;;  %v293_v23 = vsub.f32 1.0, %v2161_v51  ;;  %v678_v38 = vpop.permute.xlu0 %677 }
 0x121   :  { %v1687_v47 = vpop.eup %1686  ;;  %1413 = vmatprep.mubr.f32.mxu1 %v262_v20  ;;  %v263_v49 = vsel %vm183_vm5, %v2082_v36, %v223_v8  ;;  %1460 = vmatprep.mubr.f32.mxu0 %v2207_v35  ;;  %v226_v53 = vmul.f32 0.6931472, %v1685_v41  ;;  %v300_v31 = vmul.f32 %v292_v7, %v2156_v45  ;;  %v294_v34 = vsub.f32 1.0, %v2175_v2 }
 0x122   :  { %v1689_v55 = vpop.eup %1688  ;;  %1414 = vmatmul.mubr.f32.gmra.mrb[2].mxu1 %v263_v49  ;;  %1461 = vmatmul.mubr.f32.gmra.mrb[12].mxu0 %v2223_v43  ;;  %v235_v5 = vmul.f32 0.6931472, %v1687_v47  ;;  %v301_v32 = vmul.f32 %v293_v23, %v2161_v51  ;;  %v295_v37 = vsub.f32 1.0, %v2184_v9  ;;  %v296_v40 = vsub.f32 1.0, %v2207_v35 }
 0x123   :  { %v1691_v36 = vpop.eup %1690  ;;  %1613 = vmatpush3.bf16.msra.mxu1 %v2129_v12  ;;  %v232_v57 = vsel %vm2198_vm8, %v229_v19, %v226_v53  ;;  %v2241_v60 = vmul.f32 %v1689_v55, %v2148_v30  ;;  %v558_v30 = vld [vmem:[%s2676_s4 + $0x40] sm:$0xff]  ;;  %v564_v19 = vld [vmem:[%s2676_s4 + $0x70] sm:$0xff]  ;;  %v302_v39 = vmul.f32 %v294_v34, %v2175_v2  ;;  %v297_v20 = vsub.f32 1.0, %v2223_v43 }
 0x124   :  { %v1693_v62 = vpop.eup %1692  ;;  %v264_v63 = vsel %vm184_vm11, %v2091_v44, %v232_v57  ;;  %1615 = vmatprep.subr.bf16.mxu1 %v2133_v15  ;;  %v241_v12 = vsel %vm2229_vm9, %v238_v29, %v235_v5  ;;  %v2253_v0 = vmul.f32 %v1691_v36, %v2140_v18  ;;  %v559_v18 = vld [vmem:[%s2676_s4 + $0x48] sm:$0xff]  ;;  %v1634_v29 = vpack.c.bf16 %v565_v21, %v564_v19 }
 0x125   :  { %v1695_v3 = vpop.eup %1694  ;;  %1416 = vmatprep.mubr.f32.mxu1 %v264_v63  ;;  %v265_v44 = vsel %vm185_vm10, %v2088_v42, %v241_v12  ;;  %1463 = vmatprep.mubr.f32.mxu0 %v2241_v60  ;;  %v244_v4 = vmul.f32 0.6931472, %v1693_v62  ;;  %v1622_v14 = vpack.c.bf16 %v559_v18, %v558_v30  ;;  %v303_v41 = vmul.f32 %v295_v37, %v2184_v9  ;;  %v861_v37 = vpop.permute.xlu1 %860 }
 0x126   :  { %1417 = vmatmul.mubr.f32.gmra.mrb[4].mxu1 %v265_v44  ;;  %1464 = vmatmul.mubr.f32.gmra.mrb[14].mxu0 %v2253_v0  ;;  %v253_v11 = vmul.f32 0.6931472, %v1695_v3  ;;  %v304_v8 = vmul.f32 %v296_v40, %v2207_v35  ;;  %v298_v46 = vsub.f32 1.0, %v2241_v60  ;;  %v305_v51 = vmul.f32 %v297_v20, %v2223_v43 }
 0x127   :  { %1617 = vmatpush3.bf16.msra.mxu1 %v2133_v15  ;;  %v250_v42 = vsel %vm2244_vm12, %v247_v61, %v244_v4  ;;  %v560_v15 = vld [vmem:[%s2676_s4 + $0x50] sm:$0xff]  ;;  %v299_v47 = vsub.f32 1.0, %v2253_v0 }
 0x128   :  { %v266_v13 = vsel %vm186_vm14, %v2097_v50, %v250_v42  ;;  %1619 = vmatprep.subr.bf16.mxu1 %v1618_v54  ;;  %v259_v59 = vsel %vm2263_vm13, %v256_v1, %v253_v11  ;;  %v1626_v50 = vpack.c.bf16 %v561_v17, %v560_v15  ;;  %v306_v2 = vmul.f32 %v298_v46, %v2241_v60  ;;  %v857_v17 = vpop.permute.xlu0 %856 }
 0x129   :  { %1419 = vmatprep.mubr.f32.mxu1 %v266_v13  ;;  %v267_v16 = vsel %vm187_vm15, %v2094_v48, %v259_v59  ;;  %v563_v48 = vld [vmem:[%s2676_s4 + $0x68] sm:$0xff]  ;;  %v307_v49 = vmul.f32 %v299_v47, %v2253_v0  ;;  %s1786_s4 = smov 1   ;;  %v880_v46 = vadd.f32 %v857_v17, %v2034_v24 }
 0x12a   :  { %1420 = vmatmul.mubr.f32.gmra.mrb[6].mxu1 %v267_v16  ;;  %v1630_v45 = vpack.c.bf16 %v563_v48, %v562_v58 }
 0x12b   :  { %1621 = vmatpush3.bf16.msra.mxu1 %v1618_v54  ;;  %1498 = vmatprep.mubr.f32.mxu1 %v300_v31 }
 0x12c   :  { %1623 = vmatprep.subr.bf16.mxu1 %v1622_v14  ;;  %v863_v20 = vpop.permute.xlu0 %862 }
 0x12f   :  { %1625 = vmatpush3.bf16.msra.mxu1 %v1622_v14 }
 0x130   :  { %1627 = vmatprep.subr.bf16.mxu1 %v1626_v50 }
 0x133   :  { %1629 = vmatpush3.bf16.msra.mxu1 %v1626_v50 }
 0x134   :  { %1631 = vmatprep.subr.bf16.mxu1 %v1630_v45 }
 0x137   :  { %1633 = vmatpush3.bf16.msra.mxu1 %v1630_v45 }
 0x138   :  { %1635 = vmatprep.subr.bf16.mxu1 %v1634_v29 }
 0x13b   :  { %1637 = vmatpush3.bf16.msra.mxu1 %v1634_v29 }
 0x13e   :  { %1499 = vmatmul.mubr.f32.vlgmr.msra.gmra.mrb[8].mxu1 %v301_v32 }
 0x13f   :  { %1501 = vmatprep.mubr.f32.mxu1 %v302_v39 }
 0x142   :  { %1502 = vmatmul.mubr.f32.gmra.mrb[10].mxu1 %v303_v41  ;;  %v881_v41 = vadd.f32 %v859_v6, %v2030_v22  ;;  %v883_v22 = vadd.f32 %v863_v20, %v2044_v33 }
 0x143   :  { %1504 = vmatprep.mubr.f32.mxu1 %v304_v8 }
 0x144   :  { %v890_v24 = vmul.f32 25.0, %v881_v41 }
 0x146   :  { %1505 = vmatmul.mubr.f32.gmra.mrb[12].mxu1 %v305_v51 }
 0x147   :  { %1507 = vmatprep.mubr.f32.mxu1 %v306_v2  ;;  %v882_v2 = vadd.f32 %v861_v37, %v2038_v25 }
 0x149   :  { %v891_v25 = vmul.f32 25.0, %v882_v2 }
 0x14a   :  { %1508 = vmatmul.mubr.f32.gmra.mrb[14].mxu1 %v307_v49 }
 0x1ed   :  { %v1456_v9 = vpop.f32.mrb[8].mxu0 }
 0x1ee   :  { %1012 = vrot.lane.b32.xlu1 %v1456_v9, %s1786_s4  ;;  %v511_v35 = vpop.f32.mrb[9].mxu0  ;;  %v2318_v43 = vmul.f32 %v1456_v9, %v1456_v9 }
 0x1ef   :  { %v2315_v53 = vmul.f32 %v511_v35, %v511_v35  ;;  %1010 = vrot.lane.b32.xlu0 %v511_v35, %s1786_s4 }
 0x1f1   :  { %v1412_v56 = vpop.f32.mrb[0].mxu1  ;;  %v1459_v55 = vpop.f32.mrb[10].mxu0 }
 0x1f2   :  { %v2320_v5 = vadd.f32 %v1412_v56, %v678_v38  ;;  %v390_v54 = vpop.f32.mrb[1].mxu1  ;;  %1058 = vrot.lane.b32.xlu1 %v2315_v53, %s1785_s2  ;;  %v521_v36 = vpop.f32.mrb[11].mxu0  ;;  %v2341_v7 = vmul.f32 %v1459_v55, %v1459_v55  ;;  %v889_v56 = vmul.f32 25.0, %v880_v46 }
 0x1f3   :  { %v2324_v57 = vadd.f32 %v678_v38, %v390_v54  ;;  %1060 = vrot.lane.b32.xlu0 %v2318_v43, %s1785_s2  ;;  %v2338_v44 = vmul.f32 %v521_v36, %v521_v36  ;;  %v865_v54 = vpop.permute.xlu1 %864 }
 0x1f4   :  { %v689_v60 = vmin.f32 %v2320_v5, 20.0  ;;  %vm713_vm3 = vcmp.gt.f32.partialorder %v2320_v5, 20.0 }
 0x1f5   :  { %v688_v61 = vmin.f32 %v2324_v57, 20.0  ;;  %v1415_v52 = vpop.f32.mrb[2].mxu1  ;;  %v2330_v62 = vpop.f32.mrb[12].mxu0  ;;  %vm712_vm0 = vcmp.gt.f32.partialorder %v2324_v57, 20.0 }
 0x1f6   :  { %v698_v63 = vmul.f32 1.442695, %v689_v60  ;;  %v2332_v12 = vadd.f32 %v1415_v52, %v678_v38  ;;  %v400_v0 = vpop.f32.mrb[3].mxu1  ;;  %1016 = vrot.lane.b32.xlu1 %v1459_v55, %s1786_s4  ;;  %v531_v1 = vpop.f32.mrb[13].mxu0  ;;  %v2358_v50 = vmul.f32 %v2330_v62, %v2330_v62  ;;  %v892_v60 = vmul.f32 25.0, %v883_v22 }
 0x1f7   :  { %v696_v30 = vmul.f32 1.442695, %v688_v61  ;;  %v2335_v3 = vadd.f32 %v678_v38, %v400_v0  ;;  %1014 = vrot.lane.b32.xlu0 %v521_v36, %s1786_s4  ;;  %v2373_v39 = vmul.f32 %v531_v1, %v531_v1  ;;  %v898_v52 = vsub.f32 2.074146, %v890_v24 }
 0x1f8   :  { %v691_v4 = vmin.f32 %v2332_v12, 20.0  ;;  %v884_v0 = vadd.f32 %v865_v54, %v2048_v26  ;;  %vm715_vm8 = vcmp.gt.f32.partialorder %v2332_v12, 20.0 }
 0x1f9   :  { %1696 = vpow2.f32 %v696_v30  ;;  %v690_v18 = vmin.f32 %v2335_v3, 20.0  ;;  %v1418_v11 = vpop.f32.mrb[4].mxu1  ;;  %v2344_v42 = vpop.f32.mrb[14].mxu0  ;;  %v899_v30 = vsub.f32 2.074146, %v891_v25  ;;  %vm714_vm5 = vcmp.gt.f32.partialorder %v2335_v3, 20.0 }
 0x1fa   :  { %1698 = vpow2.f32 %v698_v63  ;;  %v702_v13 = vmul.f32 1.442695, %v691_v4  ;;  %v2346_v59 = vadd.f32 %v1418_v11, %v678_v38  ;;  %v410_v14 = vpop.f32.mrb[5].mxu1  ;;  %1062 = vrot.lane.b32.xlu1 %v2338_v44, %s1785_s2  ;;  %v2350_v16 = vpop.f32.mrb[15].mxu0  ;;  %v2371_v32 = vmul.f32 %v2344_v42, %v2344_v42 }
 0x1fb   :  { %v700_v31 = vmul.f32 1.442695, %v690_v18  ;;  %v2352_v15 = vadd.f32 %v678_v38, %v410_v14  ;;  %1064 = vrot.lane.b32.xlu0 %v2341_v7, %s1785_s2  ;;  %v2394_v35 = vmul.f32 %v2350_v16, %v2350_v16  ;;  %v897_v63 = vsub.f32 2.074146, %v889_v56  ;;  %v867_v4 = vpop.permute.xlu0 %866 }
 0x1fc   :  { %v693_v58 = vmin.f32 %v2346_v59, 20.0  ;;  %v907_v26 = vmul.f32 1.442695, %v898_v52  ;;  %vm717_vm12 = vcmp.gt.f32.partialorder %v2346_v59, 20.0 }
 0x1fd   :  { %1700 = vpow2.f32 %v700_v31  ;;  %v692_v48 = vmin.f32 %v2352_v15, 20.0  ;;  %v1421_v45 = vpop.f32.mrb[6].mxu1  ;;  %v905_v17 = vmul.f32 1.442695, %v897_v63  ;;  %vm716_vm9 = vcmp.gt.f32.partialorder %v2352_v15, 20.0 }
 0x1fe   :  { %1702 = vpow2.f32 %v702_v13  ;;  %v706_v19 = vmul.f32 1.442695, %v693_v58  ;;  %v2362_v21 = vadd.f32 %v1421_v45, %v678_v38  ;;  %v420_v29 = vpop.f32.mrb[7].mxu1  ;;  %1068 = vrot.lane.b32.xlu1 %v2358_v50, %s1785_s2  ;;  %v900_v13 = vsub.f32 2.074146, %v892_v60 }
 0x1ff   :  { %v704_v23 = vmul.f32 1.442695, %v692_v48  ;;  %v2366_v34 = vadd.f32 %v678_v38, %v420_v29  ;;  %1018 = vrot.lane.b32.xlu0 %v531_v1, %s1786_s4  ;;  %v2424_v58 = vmul.f32 25.0, %v884_v0  ;;  %v885_v48 = vadd.f32 %v867_v4, %v2056_v10 }
 0x200   :  { %v695_v8 = vmin.f32 %v2362_v21, 20.0  ;;  %v2430_v29 = vmul.f32 1.442695, %v899_v30  ;;  %vm719_vm15 = vcmp.gt.f32.partialorder %v2362_v21, 20.0 }
 0x201   :  { %1704 = vpow2.f32 %v704_v23  ;;  %v694_v40 = vmin.f32 %v2366_v34, 20.0  ;;  %v901_v24 = vsub.f32 2.074146, %v2424_v58  ;;  %vm718_vm13 = vcmp.gt.f32.partialorder %v2366_v34, 20.0 }
 0x202   :  { %1706 = vpow2.f32 %v706_v19  ;;  %1072 = vrot.lane.b32.xlu1 %v2371_v32, %s1785_s2  ;;  %v710_v38 = vmul.f32 1.442695, %v695_v8 }
 0x203   :  { %v2381_v51 = vpop.eup %1696  ;;  %v708_v47 = vmul.f32 1.442695, %v694_v40  ;;  %1066 = vrot.lane.b32.xlu0 %v2373_v39, %s1785_s2  ;;  %v2436_v40 = vmul.f32 1.442695, %v900_v13 }
 0x204   :  { %v2386_v49 = vpop.eup %1698  ;;  %v2390_v9 = vadd.f32 1.0, %v2381_v51  ;;  %v723_v18 = vmul.f32 -0.5, %v2381_v51  ;;  %v726_v20 = vand.u32 2147483647, %v2381_v51 }
 0x205   :  { %1708 = vpow2.f32 %v708_v47  ;;  %v2401_v33 = vadd.f32 1.0, %v2386_v49  ;;  %v732_v31 = vmul.f32 -0.5, %v2386_v49  ;;  %v735_v46 = vand.u32 2147483647, %v2386_v49 }
 0x206   :  { %1710 = vlog2.f32 %v2390_v9  ;;  %v724_v37 = vadd.f32 1.0, %v723_v18  ;;  %vm727_vm1 = vcmp.lt.f32.partialorder %v726_v20, 0.0004427343 }
 0x207   :  { %v2396_v55 = vpop.eup %1700  ;;  %1070 = vrot.lane.b32.xlu0 %v2394_v35, %s1785_s2  ;;  %1712 = vpow2.f32 %v710_v38  ;;  %v733_v8 = vadd.f32 1.0, %v732_v31  ;;  %v2447_v38 = vmul.f32 25.0, %v885_v48  ;;  %vm2459_vm2 = vcmp.lt.f32.partialorder %v735_v46, 0.0004427343 }
 0x208   :  { %v2403_v36 = vpop.eup %1702  ;;  %v2406_v61 = vadd.f32 1.0, %v2396_v55  ;;  %1714 = vlog2.f32 %v2401_v33  ;;  %v741_v45 = vmul.f32 -0.5, %v2396_v55  ;;  %v725_v54 = vmul.f32 %v2381_v51, %v724_v37 }
 0x209   :  { %v2413_v6 = vadd.f32 1.0, %v2403_v36  ;;  %v750_v47 = vmul.f32 -0.5, %v2403_v36  ;;  %v744_v63 = vand.u32 2147483647, %v2396_v55  ;;  %v734_v18 = vmul.f32 %v2386_v49, %v733_v8 }
 0x20a   :  { %1716 = vlog2.f32 %v2406_v61  ;;  %v742_v56 = vadd.f32 1.0, %v741_v45  ;;  %v753_v37 = vand.u32 2147483647, %v2403_v36 }
 0x20b   :  { %v2410_v1 = vpop.eup %1704  ;;  %1718 = vlog2.f32 %v2413_v6  ;;  %vm745_vm4 = vcmp.lt.f32.partialorder %v744_v63, 0.0004427343 }
 0x20c   :  { %v2417_v11 = vpop.eup %1706  ;;  %v2420_v14 = vadd.f32 1.0, %v2410_v1  ;;  %v759_v60 = vmul.f32 -0.5, %v2410_v1  ;;  %v743_v45 = vmul.f32 %v2396_v55, %v742_v56  ;;  %vm2487_vm6 = vcmp.lt.f32.partialorder %v753_v37, 0.0004427343 }
 0x20d   :  { %v2433_v23 = vadd.f32 1.0, %v2417_v11  ;;  %v768_v20 = vmul.f32 -0.5, %v2417_v11 }
 0x20e   :  { %1720 = vlog2.f32 %v2420_v14  ;;  %v760_v46 = vadd.f32 1.0, %v759_v60 }
 0x20f   :  { %v2428_v19 = vpop.eup %1708  ;;  %1722 = vpow2.f32 %v907_v26  ;;  %v751_v26 = vadd.f32 1.0, %v750_v47 }
 0x210   :  { %v2439_v41 = vadd.f32 1.0, %v2428_v19  ;;  %v1711_v2 = vpop.eup %1710  ;;  %1724 = vpow2.f32 %v905_v17  ;;  %v780_v37 = vand.u32 2147483647, %v2428_v19 }
 0x211   :  { %v1500_v10 = vpop.f32.mrb[8].mxu1  ;;  %v722_v25 = vmul.f32 0.6931472, %v1711_v2  ;;  %1726 = vlog2.f32 %v2433_v23  ;;  %v2453_v52 = vpop.eup %1712  ;;  %v777_v2 = vmul.f32 -0.5, %v2428_v19  ;;  %v752_v60 = vmul.f32 %v2403_v36, %v751_v26 }
 0x212   :  { %1108 = vrot.lane.b32.xlu1 %v1500_v10, %s1786_s4  ;;  %v632_v22 = vpop.f32.mrb[9].mxu1  ;;  %1728 = vlog2.f32 %v2439_v41  ;;  %v1715_v0 = vpop.eup %1714  ;;  %v2472_v47 = vadd.f32 1.0, %v2453_v52  ;;  %vm781_vm11 = vcmp.lt.f32.partialorder %v780_v37, 0.0004427343 }
 0x213   :  { %1106 = vrot.lane.b32.xlu0 %v632_v22, %s1786_s4  ;;  %v728_v4 = vsel %vm727_vm1, %v725_v54, %v722_v25  ;;  %v731_v10 = vmul.f32 0.6931472, %v1715_v0  ;;  %v871_v37 = vpop.permute.xlu0 %870  ;;  %vm1221_vm1 = vcmask 0  }
 0x214   :  { %v1717_v31 = vpop.eup %1716  ;;  %v2465_v48 = vsel %vm712_vm0, %v2324_v57, %v728_v4  ;;  %v762_v57 = vand.u32 2147483647, %v2410_v1  ;;  %1730 = vlog2.f32 %v2472_v47  ;;  %vm969_vm0 = vcmask 7168  }
 0x215   :  { %v1503_v30 = vpop.f32.mrb[10].mxu1  ;;  %v740_v8 = vmul.f32 0.6931472, %v1717_v31  ;;  %v1719_v22 = vpop.eup %1718  ;;  %v737_v56 = vsel %vm2459_vm2, %v734_v18, %v731_v10  ;;  %v769_v18 = vadd.f32 1.0, %v768_v20  ;;  %v761_v10 = vmul.f32 %v2410_v1, %v760_v46 }
 0x216   :  { %1112 = vrot.lane.b32.xlu1 %v1503_v30, %s1786_s4  ;;  %v642_v17 = vpop.f32.mrb[11].mxu1  ;;  %v2482_v4 = vsel %vm713_vm3, %v2320_v5, %v737_v56  ;;  %vm2493_vm7 = vcmp.lt.f32.partialorder %v762_v57, 0.0004427343  ;;  %v913_v57 = vmul.f32 1.442695, %v901_v24  ;;  %1732 = vpow2.f32 %v2430_v29 }
 0x217   :  { %v746_v54 = vsel %vm745_vm4, %v743_v45, %v740_v8  ;;  %v749_v45 = vmul.f32 0.6931472, %v1719_v22  ;;  %v786_v24 = vmul.f32 -0.5, %v2453_v52  ;;  %1734 = vpow2.f32 %v2436_v40 }
 0x218   :  { %v1721_v0 = vpop.eup %1720  ;;  %v2485_v63 = vsel %vm714_vm5, %v2335_v3, %v746_v54  ;;  %v771_v3 = vand.u32 2147483647, %v2417_v11  ;;  %1736 = vpow2.f32 %v913_v57 }
 0x219   :  { %v1506_v25 = vpop.f32.mrb[12].mxu1  ;;  %v1723_v13 = vpop.eup %1722  ;;  %v758_v26 = vmul.f32 0.6931472, %v1721_v0  ;;  %v755_v22 = vsel %vm2487_vm6, %v752_v60, %v749_v45  ;;  %v902_v0 = vsub.f32 2.074146, %v2447_v38  ;;  %v770_v45 = vmul.f32 %v2417_v11, %v769_v18 }
 0x21a   :  { %1110 = vrot.lane.b32.xlu1 %v642_v17, %s1786_s4  ;;  %v652_v30 = vpop.f32.mrb[13].mxu1  ;;  %v778_v17 = vadd.f32 1.0, %v777_v2  ;;  %v1725_v8 = vpop.eup %1724  ;;  %vm772_vm10 = vcmp.lt.f32.partialorder %v771_v3, 0.0004427343  ;;  %v789_v18 = vand.u32 2147483647, %v2453_v52 }
 0x21b   :  { %1114 = vrot.lane.b32.xlu0 %v652_v30, %s1786_s4  ;;  %v1727_v20 = vpop.eup %1726  ;;  %v764_v46 = vsel %vm2493_vm7, %v761_v10, %v758_v26  ;;  %v2511_v30 = vsel %vm715_vm8, %v2332_v12, %v755_v22  ;;  %v915_v10 = vmul.f32 1.442695, %v902_v0 }
 0x21c   :  { %v1729_v2 = vpop.eup %1728  ;;  %v2514_v31 = vsel %vm716_vm9, %v2352_v15, %v764_v46  ;;  %v767_v60 = vmul.f32 0.6931472, %v1727_v20  ;;  %v779_v58 = vmul.f32 %v2428_v19, %v778_v17  ;;  %vm790_vm14 = vcmp.lt.f32.partialorder %v789_v18, 0.0004427343  ;;  %v869_v20 = vpop.permute.xlu1 %868 }
 0x21d   :  { %v1509_v56 = vpop.f32.mrb[14].mxu1  ;;  %v776_v26 = vmul.f32 0.6931472, %v1729_v2  ;;  %1738 = vpow2.f32 %v915_v10  ;;  %v886_v57 = vadd.f32 %v869_v20, %v2060_v27 }
 0x21e   :  { %1116 = vrot.lane.b32.xlu1 %v1506_v25, %s1786_s4  ;;  %v662_v54 = vpop.f32.mrb[15].mxu1  ;;  %v773_v12 = vsel %vm772_vm10, %v770_v45, %v767_v60  ;;  %v787_v25 = vadd.f32 1.0, %v786_v24  ;;  %v1731_v17 = vpop.eup %1730  ;;  %1740 = vrcp.f32 %v2401_v33 }
 0x21f   :  { %1118 = vrot.lane.b32.xlu0 %v662_v54, %s1786_s4  ;;  %v782_v15 = vsel %vm781_vm11, %v779_v58, %v776_v26  ;;  %v2527_v38 = vsel %vm717_vm12, %v2346_v59, %v773_v12  ;;  %1742 = vrcp.f32 %v2390_v9  ;;  %v887_v54 = vadd.f32 %v871_v37, %v2068_v28 }
 0x220   :  { %v2530_v29 = vsel %vm718_vm13, %v2366_v34, %v782_v15  ;;  %v788_v59 = vmul.f32 %v2453_v52, %v787_v25  ;;  %v1733_v40 = vpop.eup %1732  ;;  %1744 = vrcp.f32 %v2413_v6  ;;  %v895_v45 = vmul.f32 25.0, %v886_v57 }
 0x221   :  { %1746 = vrcp.f32 %v2406_v61  ;;  %v896_v26 = vmul.f32 25.0, %v887_v54 }
 0x222   :  { %1020 = vrot.lane.b32.xlu1 %v2330_v62, %s1786_s4  ;;  %v785_v62 = vmul.f32 0.6931472, %v1731_v17  ;;  %1748 = vrcp.f32 %v2420_v14  ;;  %v903_v6 = vsub.f32 2.074146, %v895_v45 }
 0x223   :  { %1120 = vrot.lane.b32.xlu0 %v1509_v56, %s1786_s4  ;;  %1750 = vrcp.f32 %v2433_v23  ;;  %v904_v61 = vsub.f32 2.074146, %v896_v26 }
 0x224   :  { %v791_v34 = vsel %vm790_vm14, %v788_v59, %v785_v62  ;;  %1752 = vrcp.f32 %v2439_v41  ;;  %v917_v15 = vmul.f32 1.442695, %v903_v6 }
 0x225   :  { %v2542_v5 = vsel %vm719_vm15, %v2362_v21, %v791_v34  ;;  %1754 = vrcp.f32 %v2472_v47  ;;  %v919_v23 = vmul.f32 1.442695, %v904_v61 }
 0x226   :  { %1022 = vrot.lane.b32.xlu1 %v2350_v16, %s1786_s4  ;;  %v1735_v16 = vpop.eup %1734  ;;  %1756 = vpow2.f32 %v917_v15 }
 0x227   :  { %1024 = vrot.lane.b32.xlu0 %v2344_v42, %s1786_s4  ;;  %v1737_v42 = vpop.eup %1736  ;;  %1758 = vpow2.f32 %v919_v23 }
 0x228   :  { %v1739_v3 = vpop.eup %1738 }
 0x229   :  { %v1741_v33 = vpop.eup %1740 }
 0x22a   :  { %929 = vrot.lane.b32.xlu1 %v1725_v8, %s1787_s7  ;;  %v1743_v58 = vpop.eup %1742  ;;  %v811_v27 = vmul.f32 %v1741_v33, %v2386_v49 }
 0x22b   :  { %931 = vrot.lane.b32.xlu0 %v1723_v13, %s1787_s7  ;;  %v1745_v28 = vpop.eup %1744  ;;  %v809_v12 = vmul.f32 %v1743_v58, %v2381_v51 }
 0x22c   :  { %v1747_v14 = vpop.eup %1746  ;;  %v825_v25 = vsub.f32 1.0, %v811_v27  ;;  %v815_v18 = vmul.f32 %v1745_v28, %v2403_v36  ;;  %v995_v37 = vsub.f32 0.0, %v811_v27 }
 0x22d   :  { %v824_v10 = vsub.f32 1.0, %v809_v12  ;;  %v1749_v62 = vpop.eup %1748  ;;  %v2579_v34 = vmul.f32 %v1747_v14, %v2396_v55 }
 0x22e   :  { %933 = vrot.lane.b32.xlu1 %v1733_v40, %s1787_s7  ;;  %v833_v51 = vmul.f32 %v825_v25, %v811_v27  ;;  %v827_v47 = vsub.f32 1.0, %v815_v18  ;;  %v1751_v40 = vpop.eup %1750  ;;  %v2582_v36 = vmul.f32 %v1749_v62, %v2410_v1  ;;  %v997_v45 = vsub.f32 0.0, %v815_v18 }
 0x22f   :  { %935 = vrot.lane.b32.xlu0 %v1735_v16, %s1787_s7  ;;  %v832_v16 = vmul.f32 %v824_v10, %v809_v12  ;;  %v826_v57 = vsub.f32 1.0, %v2579_v34  ;;  %v2587_v26 = vmul.f32 %v1751_v40, %v2417_v11 }
 0x230   :  { %v835_v33 = vmul.f32 %v827_v47, %v815_v18  ;;  %v828_v28 = vsub.f32 1.0, %v2582_v36 }
 0x231   :  { %v834_v11 = vmul.f32 %v826_v57, %v2579_v34 }
 0x232   :  { %937 = vrot.lane.b32.xlu1 %v1737_v42, %s1787_s7 }
 0x236   :  { %939 = vrot.lane.b32.xlu1 %v1739_v3, %s1787_s7  ;;  %v1753_v3 = vpop.eup %1752 }
 0x237   :  { %v1755_v58 = vpop.eup %1754 }
 0x238   :  { %v2600_v62 = vmul.f32 %v1755_v58, %v2453_v52 }
 0x260   :  { %v2551_v8 = vpop.permute.xlu1 %1012 }
 0x261   :  { %v2549_v56 = vpop.permute.xlu0 %1010  ;;  %v1035_v6 = vmul.f32 %v2551_v8, %v995_v37  ;;  %v829_v8 = vsub.f32 1.0, %v2587_v26 }
 0x263   :  { %v837_v37 = vmul.f32 %v829_v8, %v2587_v26 }
 0x264   :  { %v1059_v22 = vpop.permute.xlu1 %1058 }
 0x265   :  { %v1061_v21 = vpop.permute.xlu0 %1060  ;;  %v1082_v41 = vadd.f32 %v1059_v22, %v2315_v53  ;;  %v994_v22 = vsub.f32 0.0, %v809_v12 }
 0x266   :  { %v1083_v49 = vadd.f32 %v1061_v21, %v2318_v43 }
 0x267   :  { %v1090_v55 = vmul.f32 %v1082_v41, %v832_v16  ;;  %v1034_v25 = vmul.f32 %v2549_v56, %v994_v22 }
 0x268   :  { %v2556_v46 = vpop.permute.xlu1 %1016  ;;  %v1091_v20 = vmul.f32 %v1083_v49, %v833_v51  ;;  %v1757_v51 = vpop.eup %1756 }
 0x269   :  { %v2553_v13 = vpop.permute.xlu0 %1014  ;;  %v1037_v41 = vmul.f32 %v2556_v46, %v997_v45  ;;  %v1759_v16 = vpop.eup %1758  ;;  %v996_v46 = vsub.f32 0.0, %v2579_v34 }
 0x26c   :  { %v1063_v0 = vpop.permute.xlu1 %1062 }
 0x26d   :  { %v1065_v2 = vpop.permute.xlu0 %1064  ;;  %v1084_v61 = vadd.f32 %v1063_v0, %v2338_v44  ;;  %v836_v44 = vmul.f32 %v828_v28, %v2582_v36 }
 0x26e   :  { %v1085_v43 = vadd.f32 %v1065_v2, %v2341_v7  ;;  %v2592_v7 = vmul.f32 %v1753_v3, %v2428_v19 }
 0x26f   :  { %v1092_v47 = vmul.f32 %v1084_v61, %v834_v11 }
 0x270   :  { %v2567_v9 = vpop.permute.xlu1 %1068  ;;  %v1093_v14 = vmul.f32 %v1085_v43, %v835_v33  ;;  %v830_v0 = vsub.f32 1.0, %v2592_v7  ;;  %v998_v33 = vsub.f32 0.0, %v2582_v36 }
 0x271   :  { %v2563_v60 = vpop.permute.xlu0 %1018 }
 0x274   :  { %v2574_v17 = vpop.permute.xlu1 %1072 }
 0x275   :  { %v1067_v24 = vpop.permute.xlu0 %1066 }
 0x276   :  { %v1086_v23 = vadd.f32 %v1067_v24, %v2373_v39  ;;  %v1087_v39 = vadd.f32 %v2567_v9, %v2358_v50  ;;  %v831_v9 = vsub.f32 1.0, %v2600_v62 }
 0x278   :  { %v839_v28 = vmul.f32 %v831_v9, %v2600_v62 }
 0x279   :  { %v1071_v59 = vpop.permute.xlu0 %1070 }
 0x284   :  { %v1109_v42 = vpop.permute.xlu1 %1108 }
 0x285   :  { %v1131_v21 = vmul.f32 %v1109_v42, %v811_v27  ;;  %v1107_v53 = vpop.permute.xlu0 %1106  ;;  %v1094_v42 = vmul.f32 %v1086_v23, %v836_v44 }
 0x286   :  { %v1130_v54 = vmul.f32 %v1107_v53, %v809_v12 }
 0x287   :  { %v1139_v1 = vadd.f32 %v1131_v21, %v1091_v20  ;;  %v1088_v20 = vadd.f32 %v1071_v59, %v2394_v35  ;;  %v838_v21 = vmul.f32 %v830_v0, %v2592_v7  ;;  %v1089_v35 = vadd.f32 %v2574_v17, %v2371_v32 }
 0x288   :  { %v1138_v2 = vadd.f32 %v1130_v54, %v1090_v55  ;;  %v1113_v27 = vpop.permute.xlu1 %1112  ;;  %v1036_v55 = vmul.f32 %v2553_v13, %v996_v46 }
 0x289   :  { %v1147_v12 = vmul.f32 0.5, %v1139_v1  ;;  %v1133_v15 = vmul.f32 %v1113_v27, %v815_v18  ;;  %v1096_v1 = vmul.f32 %v1088_v20, %v838_v21  ;;  %v1038_v27 = vmul.f32 %v2563_v60, %v998_v33 }
 0x28a   :  { %v1146_v10 = vmul.f32 0.5, %v1138_v2  ;;  %v1097_v32 = vmul.f32 %v1089_v35, %v839_v28 }
 0x28b   :  { %v1141_v19 = vadd.f32 %v1133_v15, %v1093_v14  ;;  %v1155_v49 = vadd.f32 %v1147_v12, %v1035_v6  ;;  %v999_v14 = vsub.f32 0.0, %v2587_v26 }
 0x28c   :  { %v1111_v18 = vpop.permute.xlu1 %1110  ;;  %v1154_v56 = vadd.f32 %v1146_v10, %v1034_v25  ;;  %v1000_v25 = vsub.f32 0.0, %v2592_v7 }
 0x28d   :  { %v1149_v24 = vmul.f32 0.5, %v1141_v19  ;;  %v1132_v40 = vmul.f32 %v1111_v18, %v2579_v34  ;;  %v1115_v52 = vpop.permute.xlu0 %1114  ;;  %1172 = vrot.lane.b32.xlu0 %v1155_v49, %s1785_s2  ;;  %v1095_v34 = vmul.f32 %v1087_v39, %v837_v37 }
 0x28e   :  { %v1134_v3 = vmul.f32 %v1115_v52, %v2582_v36  ;;  %1170 = vrot.lane.b32.xlu1 %v1154_v56, %s1785_s2 }
 0x28f   :  { %v1140_v43 = vadd.f32 %v1132_v40, %v1092_v47  ;;  %v1157_v50 = vadd.f32 %v1149_v24, %v1037_v41 }
 0x290   :  { %v1142_v53 = vadd.f32 %v1134_v3, %v1094_v42  ;;  %v1117_v22 = vpop.permute.xlu1 %1116 }
 0x291   :  { %v1148_v57 = vmul.f32 0.5, %v1140_v43  ;;  %v1135_v54 = vmul.f32 %v1117_v22, %v2587_v26  ;;  %1176 = vrot.lane.b32.xlu0 %v1157_v50, %s1785_s2  ;;  %v1119_v45 = vpop.permute.xlu0 %1118  ;;  %v1001_v26 = vsub.f32 0.0, %v2600_v62 }
 0x292   :  { %v1136_v59 = vmul.f32 %v1119_v45, %v2592_v7  ;;  %941 = vrot.lane.b32.xlu1 %v1757_v51, %s1787_s7  ;;  %v1150_v58 = vmul.f32 0.5, %v1142_v53 }
 0x293   :  { %v1143_v6 = vadd.f32 %v1135_v54, %v1095_v34  ;;  %v1156_v13 = vadd.f32 %v1148_v57, %v1036_v55 }
 0x294   :  { %v1021_v2 = vpop.permute.xlu1 %1020  ;;  %v1144_v61 = vadd.f32 %v1136_v59, %v1096_v1  ;;  %v1158_v11 = vadd.f32 %v1150_v58, %v1038_v27 }
 0x295   :  { %1174 = vrot.lane.b32.xlu0 %v1156_v13, %s1785_s2  ;;  %v1121_v36 = vpop.permute.xlu0 %1120  ;;  %v1151_v12 = vmul.f32 0.5, %v1143_v6  ;;  %v1039_v15 = vmul.f32 %v1021_v2, %v999_v14 }
 0x296   :  { %v1137_v17 = vmul.f32 %v1121_v36, %v2600_v62  ;;  %943 = vrot.lane.b32.xlu1 %v1759_v16, %s1787_s7  ;;  %v1152_v8 = vmul.f32 0.5, %v1144_v61 }
 0x297   :  { %v1159_v49 = vadd.f32 %v1151_v12, %v1039_v15 }
 0x298   :  { %v1145_v23 = vadd.f32 %v1137_v17, %v1097_v32  ;;  %v1023_v10 = vpop.permute.xlu1 %1022 }
 0x299   :  { %v1040_v60 = vmul.f32 %v1023_v10, %v1000_v25  ;;  %1178 = vrot.lane.b32.xlu0 %v1158_v11, %s1785_s2  ;;  %v1025_v19 = vpop.permute.xlu0 %1024 }
 0x29a   :  { %v1153_v41 = vmul.f32 0.5, %v1145_v23  ;;  %v1041_v0 = vmul.f32 %v1025_v19, %v1001_v26 }
 0x29b   :  { %v1160_v44 = vadd.f32 %v1152_v8, %v1040_v60 }
 0x29c   :  { %v930_v18 = vpop.permute.xlu1 %929  ;;  %v1161_v47 = vadd.f32 %v1153_v41, %v1041_v0 }
 0x29d   :  { %v953_v56 = vsub.f32 %v2465_v48, %v930_v18  ;;  %1180 = vrot.lane.b32.xlu0 %v1159_v49, %s1785_s2  ;;  %1182 = vrot.lane.b32.xlu1 %v1160_v44, %s1785_s2  ;;  %v932_v7 = vpop.permute.xlu0 %931 }
 0x29e   :  { %v954_v51 = vsub.f32 %v2482_v4, %v932_v7 }
 0x29f   :  { %v961_v39 = vmul.f32 %v953_v56, %v953_v56 }
 0x2a0   :  { %v962_v24 = vmul.f32 %v954_v51, %v954_v51  ;;  %v934_v62 = vpop.permute.xlu1 %933 }
 0x2a1   :  { %v970_v40 = vsel %vm969_vm0, %v961_v39, 0.0  ;;  %v955_v52 = vsub.f32 %v2485_v63, %v934_v62  ;;  %1184 = vrot.lane.b32.xlu0 %v1161_v47, %s1785_s2  ;;  %v936_v16 = vpop.permute.xlu0 %935 }
 0x2a2   :  { %v971_v48 = vsel %vm969_vm0, %v962_v24, 0.0  ;;  %v956_v46 = vsub.f32 %v2511_v30, %v936_v16 }
 0x2a3   :  { %v972_v42 = vadd.f32 %v971_v48, %v970_v40  ;;  %v963_v3 = vmul.f32 %v955_v52, %v955_v52 }
 0x2a4   :  { %v964_v37 = vmul.f32 %v956_v46, %v956_v46  ;;  %v938_v20 = vpop.permute.xlu1 %937 }
 0x2a5   :  { %v973_v4 = vsel %vm969_vm0, %v963_v3, 0.0  ;;  %v957_v43 = vsub.f32 %v2514_v31, %v938_v20 }
 0x2a6   :  { %v974_v50 = vadd.f32 %v973_v4, %v972_v42  ;;  %v975_v9 = vsel %vm969_vm0, %v964_v37, 0.0 }
 0x2a7   :  { %v965_v21 = vmul.f32 %v957_v43, %v957_v43 }
 0x2a8   :  { %v976_v63 = vadd.f32 %v975_v9, %v974_v50  ;;  %v940_v53 = vpop.permute.xlu1 %939 }
 0x2a9   :  { %v977_v22 = vsel %vm969_vm0, %v965_v21, 0.0  ;;  %v958_v55 = vsub.f32 %v2527_v38, %v940_v53 }
 0x2aa   :  { %v978_v34 = vadd.f32 %v977_v22, %v976_v63 }
 0x2ab   :  { %v966_v30 = vmul.f32 %v958_v55, %v958_v55 }
 0x2ad   :  { %v979_v57 = vsel %vm969_vm0, %v966_v30, 0.0 }
 0x2ae   :  { %v980_v54 = vadd.f32 %v979_v57, %v978_v34 }
 0x2ff   :  { %v1173_v45 = vpop.permute.xlu0 %1172 }
 0x300   :  { %v1171_v33 = vpop.permute.xlu1 %1170  ;;  %v1195_v31 = vsel %vm969_vm0, %v1173_v45, 0.0 }
 0x301   :  { %v1194_v59 = vsel %vm969_vm0, %v1171_v33, 0.0 }
 0x302   :  { %v1196_v6 = vadd.f32 %v1195_v31, %v1194_v59 }
 0x303   :  { %v1177_v35 = vpop.permute.xlu0 %1176 }
 0x304   :  { %v942_v1 = vpop.permute.xlu1 %941  ;;  %v1199_v36 = vsel %vm969_vm0, %v1177_v35, 0.0 }
 0x305   :  { %v959_v58 = vsub.f32 %v2530_v29, %v942_v1 }
 0x307   :  { %v967_v13 = vmul.f32 %v959_v58, %v959_v58  ;;  %v1175_v28 = vpop.permute.xlu0 %1174 }
 0x308   :  { %v1197_v38 = vsel %vm969_vm0, %v1175_v28, 0.0  ;;  %v944_v2 = vpop.permute.xlu1 %943 }
 0x309   :  { %v981_v27 = vsel %vm969_vm0, %v967_v13, 0.0  ;;  %v1198_v61 = vadd.f32 %v1197_v38, %v1196_v6  ;;  %v960_v14 = vsub.f32 %v2542_v5, %v944_v2 }
 0x30a   :  { %v982_v32 = vadd.f32 %v981_v27, %v980_v54 }
 0x30b   :  { %v968_v17 = vmul.f32 %v960_v14, %v960_v14  ;;  %v1200_v12 = vadd.f32 %v1199_v36, %v1198_v61  ;;  %v1179_v15 = vpop.permute.xlu0 %1178 }
 0x30c   :  { %v1201_v25 = vsel %vm969_vm0, %v1179_v15, 0.0 }
 0x30d   :  { %v983_v29 = vsel %vm969_vm0, %v968_v17, 0.0  ;;  %v1202_v23 = vadd.f32 %v1201_v25, %v1200_v12 }
 0x30e   :  { %v984_v11 = vadd.f32 %v983_v29, %v982_v32 }
 0x30f   :  { %v1183_v10 = vpop.permute.xlu1 %1182  ;;  %v1181_v8 = vpop.permute.xlu0 %1180 }
 0x310   :  { %v1203_v60 = vsel %vm969_vm0, %v1181_v8, 0.0  ;;  %985 = vadd.xlane.f32.xlu1 %v984_v11  ;;  %v1205_v5 = vsel %vm969_vm0, %v1183_v10, 0.0 }
 0x311   :  { %v1204_v26 = vadd.f32 %v1203_v60, %v1202_v23 }
 0x313   :  { %v1185_v19 = vpop.permute.xlu0 %1184  ;;  %v1206_v49 = vadd.f32 %v1205_v5, %v1204_v26 }
 0x314   :  { %v1207_v41 = vsel %vm969_vm0, %v1185_v19, 0.0 }
 0x315   :  { %v1208_v44 = vadd.f32 %v1207_v41, %v1206_v49 }
 0x317   :  { %1209 = vadd.xlane.f32.xlu0 %v1208_v44 }
 0x39d   :  { %v986_v0 = vpop.xlane.xlu1 %985 }
 0x39e   :  { %v987_v18 = vrot.slane %v986_v0, 4 }
 0x3a0   :  { %v988_v56 = vadd.f32 %v987_v18, %v986_v0 }
 0x3a2   :  { %v989_v7 = vrot.slane %v988_v56, 2 }
 0x3a4   :  { %v1210_v51 = vpop.xlane.xlu0 %1209  ;;  %v990_v47 = vadd.f32 %v989_v7, %v988_v56 }
 0x3a5   :  { %v1211_v39 = vrot.slane %v1210_v51, 4 }
 0x3a6   :  { %v991_v24 = vrot.slane %v990_v47, 1 }
 0x3a7   :  { %v1212_v62 = vadd.f32 %v1211_v39, %v1210_v51 }
 0x3a8   :  { %v992_v40 = vadd.f32 %v991_v24, %v990_v47 }
 0x3a9   :  { %v1213_v52 = vrot.slane %v1212_v62, 2 }
 0x3aa   :  { %1638 = vpush %v992_v40 }
 0x3ab   :  { %v1214_v16 = vadd.f32 %v1213_v52, %v1212_v62 }
 0x3ad   :  { %v1215_v48 = vrot.slane %v1214_v16, 1 }
 0x3af   :  { %v1216_v46 = vadd.f32 %v1215_v48, %v1214_v16 }
 0x3b1   :  { %1640 = vpush %v1216_v46 }
 0x3db   :  { %s1639_s2 = spop %1638 }
 0x3e2   :  { %s1641_s8 = spop %1640 }
 0x3e3   :  { %s1218_s9 = smul.f32 %s1641_s8, %s1641_s8 }
 0x3e5   :  { %s1219_s11 = sadd.f32 %s1639_s2, %s1218_s9 }
 0x3e7   :  { %v1220_v42 = vstv %s1219_s11 }
 0x3e8   :  { %1222 = vst.msk [vmem:[#allocation3] sm:$0x1] %vm1221_vm1, %v1220_v42 }
 0x3e9   :  { %1771 = shalt.err (!%p1768_p4)
}
 0x3ea   :  { %s1772_s16 = scalar_lea.hbm %s2678_s6, 16 }
 0x3eb   :  { %p1773_p5 = scmp.ne.s32.totalorder %s2678_s6, %s1772_s16  ;;  %p1776_p6 = scmp.lt.u32.totalorder %s1772_s16, %s2678_s6 }
 0x3ed   :  { %p1778_p7 = pnand %p1776_p6, %p1773_p5 }
 0x3ef   :  { %1781 = shalt.err (!%p1778_p7)
}
 0x3f0   :  { %1232 = dma.vmem_to_hbm [thread:$0]  %s1230_s1, 16, %s2678_s6, [#allocation4]  }
 0x3f1   :  { %1782 = dma.done.wait [#allocation4], 16  }
 0x3f2   :  { %1783 = vsyncadd [#allocation4], 4294967280 }
 0x3f3   :  { %1236 = vsyncpa [#allocation4], 1 }

</bundles_post_ra>
